<compile_context>
chip_gen: v5e
topology: v5e:2x2
jax: 0.10.0
libtpu: 0.0.40
codegen_flags: <defaults>
</compile_context>

<pallas_src>
import functools

import jax
import jax.numpy as jnp
from jax.experimental import pallas as pl
from jax.experimental.pallas import tpu as pltpu


def _round_up(a, b):
    return (a + b - 1) // b * b


# ---------------------------------------------------------------------------
# Shared MLP core: net_p + 4x ResnetBlockFC + net_out on feature-major tiles.
# Weights live in two packed slabs (weight slab (R, max_k), bias slab (R, 1));
# each logical matrix is addressed by a static (row_offset, rows, k) triple.
# No concatenates: every fused layer is a sum of split dots.
# ---------------------------------------------------------------------------
def _mlp_core(w_ref, b_ref, offs, coords8, xl, xm, xh):
    relu = lambda v: jnp.maximum(v, 0.0)
    dot = lambda a, b: jnp.dot(a, b, preferred_element_type=jnp.float32)

    def W(name):
        o, r, k = offs[name]
        return w_ref[o:o + r, :k]

    def Bv(name):
        o, r, _ = offs[name]
        return b_ref[o:o + r, :]

    # Stage 1: net_p(coords) + net_res1(x_l).  net_p bias folded into Bv('u1').
    n = relu(dot(W('w01'), relu(xl)) + Bv('w01'))
    x = dot(W('wp'), coords8) + dot(W('ws1'), xl) + dot(W('u1'), n) + Bv('u1')

    # Stage 2: net_res2(cat(x, x_m)) — the concat becomes accumulated split dots.
    n = relu(dot(W('w0a2'), relu(x)) + dot(W('w0b2'), relu(xm)) + Bv('w0a2'))
    x = dot(W('wsa2'), x) + dot(W('wsb2'), xm) + dot(W('u2'), n) + Bv('u2')

    # Stage 3: net_res3(cat(x, x_h)).
    n = relu(dot(W('w0a3'), relu(x)) + dot(W('w0b3'), relu(xh)) + Bv('w0a3'))
    x = dot(W('wsa3'), x) + dot(W('wsb3'), xh) + dot(W('u3'), n) + Bv('u3')

    # Stage 4: net_res4 (identity shortcut).
    n = relu(dot(W('w04'), relu(x)) + Bv('w04'))
    x = x + dot(W('u4'), n) + Bv('u4')

    # net_out -> Bernoulli logits (rows padded to a multiple of 8).
    return dot(W('wo'), x) + Bv('wo')


# ---------------------------------------------------------------------------
# Kernel A: in-kernel triplane sampling (small planes, resident in VMEM).
# ---------------------------------------------------------------------------
def _sample_mlp_kernel(coords_ref, fxy_ref, fyz_ref, fxz_ref, w_ref, b_ref,
                       out_ref, *, ld, hw, H, W, offs, single_out):
    c = coords_ref[...]                                      # (8, tm) f32
    cx, cy, cz = c[0:1, :], c[1:2, :], c[2:3, :]
    tm = c.shape[1]
    hidx = jax.lax.broadcasted_iota(jnp.int32, (hw, tm), 0)  # hoisted (shared)

    def sample_mat(gxc, gyc):
        # F.grid_sample(bilinear, padding_mode='border', align_corners=True)
        gx = jnp.clip((gxc + 1.0) * 0.5 * (W - 1), 0.0, W - 1)
        gy = jnp.clip((gyc + 1.0) * 0.5 * (H - 1), 0.0, H - 1)
        x0 = jnp.floor(gx)
        y0 = jnp.floor(gy)
        wx = gx - x0
        wy = gy - y0
        x0i = x0.astype(jnp.int32)
        y0i = y0.astype(jnp.int32)
        x1i = jnp.minimum(x0i + 1, W - 1)
        y1i = jnp.minimum(y0i + 1, H - 1)

        def corner(yi, xi, wgt):
            return jnp.where(hidx == yi * W + xi, wgt, 0.0)

        return (corner(y0i, x0i, (1.0 - wx) * (1.0 - wy))
                + corner(y0i, x1i, wx * (1.0 - wy))
                + corner(y1i, x0i, (1.0 - wx) * wy)
                + corner(y1i, x1i, wx * wy))                 # (hw, tm)

    dot = lambda a, b: jnp.dot(a, b, preferred_element_type=jnp.float32)
    # Each plane operand carries its 3 levels stacked along C -> (3*ld, hw),
    # so the whole triplane positional encoding is 3 MXU matmuls per tile.
    feats = (dot(fxy_ref[...], sample_mat(cx, cy))
             + dot(fyz_ref[...], sample_mat(cy, cz))
             + dot(fxz_ref[...], sample_mat(cx, cz)))        # (3*ld, tm)
    xl = feats[:ld, :]
    xm = feats[ld:2 * ld, :]
    xh = feats[2 * ld:, :]

    logits = _mlp_core(w_ref, b_ref, offs, c, xl, xm, xh)
    if single_out:
        out_ref[...] = logits[0:1, :].astype(out_ref.dtype)  # (1, tm) lane-dense
    else:
        out_ref[...] = logits.astype(out_ref.dtype)


# ---------------------------------------------------------------------------
# Kernel B (fallback, large planes): stream pre-gathered bf16 features.
# ---------------------------------------------------------------------------
def _stream_mlp_kernel(coords_ref, feats_ref, w_ref, b_ref, out_ref,
                       *, ld, offs, single_out):
    c = coords_ref[...]                                      # (8, tm) f32
    f = feats_ref[...].astype(jnp.float32)                   # (3*ld, tm) bf16->f32
    xl = f[:ld, :]
    xm = f[ld:2 * ld, :]
    xh = f[2 * ld:, :]
    logits = _mlp_core(w_ref, b_ref, offs, c, xl, xm, xh)
    if single_out:
        out_ref[...] = logits[0:1, :].astype(out_ref.dtype)
    else:
        out_ref[...] = logits.astype(out_ref.dtype)


# ---------------------------------------------------------------------------
# Plane sampling for the reference / fallback path
# (F.grid_sample, bilinear / border / align_corners=True).
# ---------------------------------------------------------------------------
def _bilinear_corners(grid, H, W):
    gx = jnp.clip((grid[..., 0] + 1.0) * 0.5 * (W - 1), 0.0, W - 1)
    gy = jnp.clip((grid[..., 1] + 1.0) * 0.5 * (H - 1), 0.0, H - 1)
    x0 = jnp.floor(gx)
    y0 = jnp.floor(gy)
    wx = gx - x0
    wy = gy - y0
    x0i = x0.astype(jnp.int32)
    y0i = y0.astype(jnp.int32)
    x1i = jnp.minimum(x0i + 1, W - 1)
    y1i = jnp.minimum(y0i + 1, H - 1)
    return x0i, x1i, y0i, y1i, wx, wy


def grid_sample_gather(feat, grid):
    """feat: (B, C, H, W); grid: (B, N, 2) in [-1, 1], (x, y) order -> (B, C, N)."""
    B, C, H, W = feat.shape
    x0i, x1i, y0i, y1i, wx, wy = _bilinear_corners(grid, H, W)
    flat = feat.reshape(B, C, H * W)

    def gather(yi, xi):
        idx = (yi * W + xi)[:, None, :]
        return jnp.take_along_axis(flat, idx, axis=2)

    wx = wx[:, None, :]
    wy = wy[:, None, :]
    return (gather(y0i, x0i) * (1 - wx) * (1 - wy)
            + gather(y0i, x1i) * wx * (1 - wy)
            + gather(y1i, x0i) * (1 - wx) * wy
            + gather(y1i, x1i) * wx * wy)


# ---------------------------------------------------------------------------
# Weight packing: 27 raw tensors -> one weight slab + one bias slab.
# ---------------------------------------------------------------------------
def pack_params(params):
    f32 = jnp.float32
    wp = jnp.asarray(params['wp'], f32)                  # (in_ch, ch)
    in_ch, ch = wp.shape
    ld = params['r1_ws'].shape[0]
    h1 = params['r1_w0'].shape[1]
    out_ch = params['wo'].shape[1]
    orows = _round_up(max(out_ch, 1), 8)
    max_k = max(ch, ld, h1, 8)

    def T(a):
        return jnp.asarray(a, f32).T

    blocks = []
    wp8 = jnp.zeros((ch, 8), f32).at[:, :in_ch].set(T(wp))      # cols in_ch..7 zero
    blocks.append(('wp', wp8, None))                            # bias folded into 'u1'
    blocks.append(('w01', T(params['r1_w0']), jnp.asarray(params['r1_b0'], f32)[0]))
    blocks.append(('u1', T(params['r1_w1']),
                   jnp.asarray(params['bp'], f32)[0] + jnp.asarray(params['r1_b1'], f32)[0]))
    blocks.append(('ws1', T(params['r1_ws']), None))
    for s in (2, 3):
        blocks.append((f'w0a{s}', T(params[f'r{s}_w0a']), jnp.asarray(params[f'r{s}_b0'], f32)[0]))
        blocks.append((f'w0b{s}', T(params[f'r{s}_w0b']), None))
        blocks.append((f'u{s}', T(params[f'r{s}_w1']), jnp.asarray(params[f'r{s}_b1'], f32)[0]))
        blocks.append((f'wsa{s}', T(params[f'r{s}_wsa']), None))
        blocks.append((f'wsb{s}', T(params[f'r{s}_wsb']), None))
    blocks.append(('w04', T(params['r4_w0']), jnp.asarray(params['r4_b0'], f32)[0]))
    blocks.append(('u4', T(params['r4_w1']), jnp.asarray(params['r4_b1'], f32)[0]))
    wo = jnp.zeros((orows, ch), f32).at[:out_ch, :].set(T(params['wo']))
    bo = jnp.zeros((orows,), f32).at[:out_ch].set(jnp.asarray(params['bo'], f32)[0])
    blocks.append(('wo', wo, bo))

    offs, rtot = {}, 0
    for name, w, _ in blocks:
        offs[name] = (rtot, w.shape[0], w.shape[1])
        rtot += _round_up(w.shape[0], 8)                 # keep 8-aligned row offsets
    rtot = _round_up(rtot, 8)

    wslab = jnp.zeros((rtot, max_k), f32)
    bslab = jnp.zeros((rtot, 1), f32)
    for name, w, b in blocks:
        o, r, k = offs[name]
        wslab = wslab.at[o:o + r, :k].set(w)
        if b is not None:
            bslab = bslab.at[o:o + r, 0].set(b)

    meta = dict(ch=ch, ld=ld, h1=h1, out_ch=out_ch, orows=orows)
    return wslab, bslab, offs, meta


# ---------------------------------------------------------------------------
# Raw params (mirrors the PyTorch module's Linear / ResnetBlockFC weights)
# ---------------------------------------------------------------------------
def make_params(key, *, in_ch=3, latent_dim=16, out_ch=1, ch=32):
    keys = iter(jax.random.split(key, 64))

    def w(shape, scale=0.1):
        return jax.random.normal(next(keys), shape, jnp.float32) * scale

    h1 = min(latent_dim, ch)   # ResnetBlockFC hidden size of net_res1
    return {
        'wp': w((in_ch, ch)), 'bp': w((1, ch)),
        'r1_w0': w((latent_dim, h1)), 'r1_b0': w((1, h1)),
        'r1_w1': w((h1, ch)), 'r1_b1': w((1, ch)),
        'r1_ws': w((latent_dim, ch)),
        'r2_w0a': w((ch, ch)), 'r2_w0b': w((latent_dim, ch)), 'r2_b0': w((1, ch)),
        'r2_w1': w((ch, ch)), 'r2_b1': w((1, ch)),
        'r2_wsa': w((ch, ch)), 'r2_wsb': w((latent_dim, ch)),
        'r3_w0a': w((ch, ch)), 'r3_w0b': w((latent_dim, ch)), 'r3_b0': w((1, ch)),
        'r3_w1': w((ch, ch)), 'r3_b1': w((1, ch)),
        'r3_wsa': w((ch, ch)), 'r3_wsb': w((latent_dim, ch)),
        'r4_w0': w((ch, ch)), 'r4_b0': w((1, ch)),
        'r4_w1': w((ch, ch)), 'r4_b1': w((1, ch)),
        'wo': w((ch, out_ch)), 'bo': w((1, out_ch)),
    }


# ---------------------------------------------------------------------------
# Forward wrapper
# ---------------------------------------------------------------------------
@functools.partial(jax.jit, static_argnames=('tm',))
def mlp3d_forward(coords, hdbf, params, *, tm=1024):
    """coords: (B, N, 3) in [-1, 1].
    hdbf: tuple of 3 (xy, yz, xz) tuples of 3 planes, each (B, latent_dim, H, W).
    Returns Bernoulli logits: (B, N) (or (B, N, out_ch) if out_ch > 1)."""
    B, N, cdim = coords.shape
    assert cdim == 3
    wslab, bslab, offs, meta = pack_params(params)
    ld, out_ch, orows = meta['ld'], meta['out_ch'], meta['orows']
    single_out = (out_ch == 1)

    # Tile size: sweep upward on v6e/v7x (2048/4096); clamp for tiny N.
    tm_eff = _round_up(min(tm, _round_up(N, 128)), 128)
    n_pad = _round_up(N, tm_eff)

    # Single small coords stream (8 rows: x, y, z + zero pad), padded to n_pad.
    coords_t = jnp.transpose(coords, (0, 2, 1)).astype(jnp.float32)       # (B, 3, N)
    coords_p = jnp.pad(coords_t, ((0, 0), (0, 8 - 3), (0, n_pad - N)))    # (B, 8, n_pad)

    H0, W0 = hdbf[0][0].shape[2], hdbf[0][0].shape[3]
    same_res = all(tuple(hdbf[p][l].shape) == (B, ld, H0, W0)
                   for p in range(3) for l in range(3))
    hw = H0 * W0
    # In-kernel sampling only while the per-tile (hw, tm) corner-weight
    # matrices stay cheap (VPU build cost ~ hw) and small in VMEM.
    use_inkernel = same_res and hw <= 512 and (3 * hw * tm_eff * 4) <= (8 << 20)

    grid = (B, n_pad // tm_eff)
    coords_spec = pl.BlockSpec((None, 8, tm_eff), lambda b, i: (b, 0, i))
    wslab_spec = pl.BlockSpec(wslab.shape, lambda b, i: (0, 0))
    bslab_spec = pl.BlockSpec(bslab.shape, lambda b, i: (0, 0))
    if single_out:
        out_shape = jax.ShapeDtypeStruct((B, 1, n_pad), jnp.float32)
        out_spec = pl.BlockSpec((None, 1, tm_eff), lambda b, i: (b, 0, i))
    else:
        out_shape = jax.ShapeDtypeStruct((B, orows, n_pad), jnp.float32)
        out_spec = pl.BlockSpec((None, orows, tm_eff), lambda b, i: (b, 0, i))
    cparams = pltpu.CompilerParams(dimension_semantics=("parallel", "parallel"))

    if use_inkernel:
        # Per-plane operand: 3 levels stacked along C -> (B, 3*ld, H*W),
        # resident in VMEM (re-DMA'd only when the batch index changes).
        planes = [jnp.concatenate([hdbf[p][l].reshape(B, ld, hw) for l in range(3)],
                                  axis=1).astype(jnp.float32)
                  for p in range(3)]
        plane_spec = pl.BlockSpec((None, 3 * ld, hw), lambda b, i: (b, 0, 0))
        kern = functools.partial(_sample_mlp_kernel, ld=ld, hw=hw, H=H0, W=W0,
                                 offs=offs, single_out=single_out)
        out = pl.pallas_call(
            kern, out_shape=out_shape, grid=grid,
            in_specs=[coords_spec, plane_spec, plane_spec, plane_spec,
                      wslab_spec, bslab_spec],
            out_specs=out_spec, compiler_params=cparams,
        )(coords_p, planes[0], planes[1], planes[2], wslab, bslab)
    else:
        # Fallback for large planes: gather in the wrapper, stream bf16 feats.
        xy = coords[..., (0, 1)]
        yz = coords[..., (1, 2)]
        xz = coords[..., (0, 2)]

        def tpe(level):
            return (grid_sample_gather(hdbf[0][level], xy)
                    + grid_sample_gather(hdbf[1][level], yz)
                    + grid_sample_gather(hdbf[2][level], xz))    # (B, ld, N)

        feats = jnp.concatenate([tpe(0), tpe(1), tpe(2)], axis=1).astype(jnp.bfloat16)
        feats = jnp.pad(feats, ((0, 0), (0, 0), (0, n_pad - N)))  # (B, 3*ld, n_pad)
        feat_spec = pl.BlockSpec((None, 3 * ld, tm_eff), lambda b, i: (b, 0, i))
        kern = functools.partial(_stream_mlp_kernel, ld=ld, offs=offs,
                                 single_out=single_out)
        out = pl.pallas_call(
            kern, out_shape=out_shape, grid=grid,
            in_specs=[coords_spec, feat_spec, wslab_spec, bslab_spec],
            out_specs=out_spec, compiler_params=cparams,
        )(coords_p, feats, wslab, bslab)

    if single_out:
        return out[:, 0, :N] if n_pad != N else out[:, 0, :]
    out = out[:, :out_ch, :N]
    return jnp.transpose(out, (0, 2, 1))


# ---------------------------------------------------------------------------
# Pure-JAX reference (matches the PyTorch forward, point-major layout)
# ---------------------------------------------------------------------------
def mlp3d_reference(coords, hdbf, params):
    hp = jax.lax.Precision.HIGHEST
    relu = lambda v: jnp.maximum(v, 0.0)
    dot = lambda a, b: jnp.dot(a, b, precision=hp)

    xy = coords[..., (0, 1)]
    yz = coords[..., (1, 2)]
    xz = coords[..., (0, 2)]

    def tpe(level):
        f = (grid_sample_gather(hdbf[0][level], xy)
             + grid_sample_gather(hdbf[1][level], yz)
             + grid_sample_gather(hdbf[2][level], xz))
        return jnp.transpose(f, (0, 2, 1))               # (B, N, ld)

    xl, xm, xh = tpe(0), tpe(1), tpe(2)

    p = dot(coords, params['wp']) + params['bp']
    net = dot(relu(xl), params['r1_w0']) + params['r1_b0']
    dx = dot(relu(net), params['r1_w1']) + params['r1_b1']
    x = p + dot(xl, params['r1_ws']) + dx

    xc = jnp.concatenate([x, xm], axis=-1)
    w0 = jnp.concatenate([params['r2_w0a'], params['r2_w0b']], axis=0)
    ws = jnp.concatenate([params['r2_wsa'], params['r2_wsb']], axis=0)
    net = dot(relu(xc), w0) + params['r2_b0']
    dx = dot(relu(net), params['r2_w1']) + params['r2_b1']
    x = dot(xc, ws) + dx

    xc = jnp.concatenate([x, xh], axis=-1)
    w0 = jnp.concatenate([params['r3_w0a'], params['r3_w0b']], axis=0)
    ws = jnp.concatenate([params['r3_wsa'], params['r3_wsb']], axis=0)
    net = dot(relu(xc), w0) + params['r3_b0']
    dx = dot(relu(net), params['r3_w1']) + params['r3_b1']
    x = dot(xc, ws) + dx

    net = dot(relu(x), params['r4_w0']) + params['r4_b0']
    dx = dot(relu(net), params['r4_w1']) + params['r4_b1']
    x = x + dx

    return (dot(x, params['wo']) + params['bo'])[..., 0]


if __name__ == "__main__":
    key = jax.random.PRNGKey(0)
    k_par, k_c, k_f = jax.random.split(key, 3)

    B, N, LD, CH, OUT_CH, RES = 2, 64, 16, 32, 1, 8
    params = make_params(k_par, in_ch=3, latent_dim=LD, out_ch=OUT_CH, ch=CH)

    # --- Test 1: small planes -> in-kernel bilinear sampling path ---
    coords = jax.random.uniform(k_c, (B, N, 3), jnp.float32, minval=-1.0, maxval=1.0)
    fkeys = jax.random.split(k_f, 9)
    hdbf = tuple(
        tuple(jax.random.normal(fkeys[3 * pi + li], (B, LD, RES, RES), jnp.float32)
              for li in range(3))
        for pi in range(3))
    logits = jax.block_until_ready(mlp3d_forward(coords, hdbf, params))
    ref = mlp3d_reference(coords, hdbf, params)
    assert logits.shape == (B, N), logits.shape
    err_a = float(jnp.max(jnp.abs(logits - ref)))
    assert err_a < 2e-3, err_a       # f32 chain, default MXU precision in-kernel

    # --- Test 2: larger planes + unaligned N -> bf16 streaming fallback ---
    N2, RES2 = 200, 32
    coords2 = jax.random.uniform(jax.random.PRNGKey(7), (B, N2, 3), jnp.float32,
                                 minval=-1.0, maxval=1.0)
    fkeys2 = jax.random.split(jax.random.PRNGKey(11), 9)
    hdbf2 = tuple(
        tuple(jax.random.normal(fkeys2[3 * pi + li], (B, LD, RES2, RES2), jnp.float32)
              for li in range(3))
        for pi in range(3))
    logits2 = jax.block_until_ready(mlp3d_forward(coords2, hdbf2, params))
    ref2 = mlp3d_reference(coords2, hdbf2, params)
    assert logits2.shape == (B, N2), logits2.shape
    err_b = float(jnp.max(jnp.abs(logits2 - ref2)))
    assert err_b < 2e-2, err_b       # looser: features stream through HBM as bf16

    print("KERNEL_OK")
</pallas_src>

<mosaic_0001>
module attributes {stable_mosaic.version = 11 : i64} {
  func.func @_sample_mlp_kernel(%arg0: i32, %arg1: i32, %arg2: memref<1x8x128xf32, #tpu.memory_space<vmem>>, %arg3: memref<1x48x64xf32, #tpu.memory_space<vmem>>, %arg4: memref<1x48x64xf32, #tpu.memory_space<vmem>>, %arg5: memref<1x48x64xf32, #tpu.memory_space<vmem>>, %arg6: memref<504x32xf32, #tpu.memory_space<vmem>>, %arg7: memref<504x1xf32, #tpu.memory_space<vmem>>, %arg8: memref<1x1x128xf32, #tpu.memory_space<vmem>>) attributes {dimension_semantics = [#tpu.dimension_semantics<parallel>, #tpu.dimension_semantics<parallel>], iteration_bounds = array<i64: 2, 1>, scalar_prefetch = 0 : i64, scratch_operands = 0 : i64, tpu.core_type = #tpu.core_type<tc>, window_params = [{transform_indices = @transform_0, window_bounds = array<i64: 1, 8, 128>}, {transform_indices = @transform_1, window_bounds = array<i64: 1, 48, 64>}, {transform_indices = @transform_2, window_bounds = array<i64: 1, 48, 64>}, {transform_indices = @transform_3, window_bounds = array<i64: 1, 48, 64>}, {pipeline_mode = #tpu.pipeline_mode<synchronous>, transform_indices = @transform_4, window_bounds = array<i64: 504, 32>}, {pipeline_mode = #tpu.pipeline_mode<synchronous>, transform_indices = @transform_5, window_bounds = array<i64: 504, 1>}, {transform_indices = @transform_6, window_bounds = array<i64: 1, 1, 128>}]} {
    %c0 = arith.constant 0 : index
    %c0_0 = arith.constant 0 : index
    %c0_1 = arith.constant 0 : index
    %0 = vector.load %arg2[%c0, %c0_0, %c0_1] : memref<1x8x128xf32, #tpu.memory_space<vmem>>, vector<1x8x128xf32>
    %1 = vector.shape_cast %0 : vector<1x8x128xf32> to vector<8x128xf32>
    %2 = vector.extract_strided_slice %1 {offsets = [0, 0], sizes = [1, 128], strides = [1, 1]} : vector<8x128xf32> to vector<1x128xf32>
    %3 = vector.extract_strided_slice %1 {offsets = [1, 0], sizes = [1, 128], strides = [1, 1]} : vector<8x128xf32> to vector<1x128xf32>
    %4 = vector.extract_strided_slice %1 {offsets = [2, 0], sizes = [1, 128], strides = [1, 1]} : vector<8x128xf32> to vector<1x128xf32>
    %5 = tpu.iota {dimensions = array<i32: 0>} : vector<64x128xi32>
    %c0_2 = arith.constant 0 : index
    %c0_3 = arith.constant 0 : index
    %c0_4 = arith.constant 0 : index
    %6 = vector.load %arg3[%c0_2, %c0_3, %c0_4] : memref<1x48x64xf32, #tpu.memory_space<vmem>>, vector<1x48x64xf32>
    %7 = vector.shape_cast %6 : vector<1x48x64xf32> to vector<48x64xf32>
    %cst = arith.constant 1.000000e+00 : f32
    %8 = vector.broadcast %cst : f32 to vector<1x128xf32>
    %9 = arith.addf %2, %8 : vector<1x128xf32>
    %cst_5 = arith.constant 5.000000e-01 : f32
    %10 = vector.broadcast %cst_5 : f32 to vector<1x128xf32>
    %11 = arith.mulf %9, %10 : vector<1x128xf32>
    %cst_6 = arith.constant 7.000000e+00 : f32
    %12 = vector.broadcast %cst_6 : f32 to vector<1x128xf32>
    %13 = arith.mulf %11, %12 : vector<1x128xf32>
    %cst_7 = arith.constant 0.000000e+00 : f32
    %c7_i32 = arith.constant 7 : i32
    %14 = vector.broadcast %cst_7 : f32 to vector<1x128xf32>
    %15 = arith.maximumf %14, %13 : vector<1x128xf32>
    %16 = arith.sitofp %c7_i32 : i32 to f32
    %17 = vector.broadcast %16 : f32 to vector<1x128xf32>
    %18 = arith.minimumf %17, %15 : vector<1x128xf32>
    %cst_8 = arith.constant 1.000000e+00 : f32
    %19 = vector.broadcast %cst_8 : f32 to vector<1x128xf32>
    %20 = arith.addf %3, %19 : vector<1x128xf32>
    %cst_9 = arith.constant 5.000000e-01 : f32
    %21 = vector.broadcast %cst_9 : f32 to vector<1x128xf32>
    %22 = arith.mulf %20, %21 : vector<1x128xf32>
    %cst_10 = arith.constant 7.000000e+00 : f32
    %23 = vector.broadcast %cst_10 : f32 to vector<1x128xf32>
    %24 = arith.mulf %22, %23 : vector<1x128xf32>
    %cst_11 = arith.constant 0.000000e+00 : f32
    %c7_i32_12 = arith.constant 7 : i32
    %25 = vector.broadcast %cst_11 : f32 to vector<1x128xf32>
    %26 = arith.maximumf %25, %24 : vector<1x128xf32>
    %27 = arith.sitofp %c7_i32_12 : i32 to f32
    %28 = vector.broadcast %27 : f32 to vector<1x128xf32>
    %29 = arith.minimumf %28, %26 : vector<1x128xf32>
    %30 = math.floor %18 : vector<1x128xf32>
    %31 = math.floor %29 : vector<1x128xf32>
    %32 = arith.subf %18, %30 : vector<1x128xf32>
    %33 = arith.subf %29, %31 : vector<1x128xf32>
    %34 = arith.fptosi %30 : vector<1x128xf32> to vector<1x128xi32>
    %35 = arith.fptosi %31 : vector<1x128xf32> to vector<1x128xi32>
    %c1_i32 = arith.constant 1 : i32
    %36 = vector.broadcast %c1_i32 : i32 to vector<1x128xi32>
    %37 = arith.addi %34, %36 : vector<1x128xi32>
    %c7_i32_13 = arith.constant 7 : i32
    %38 = vector.broadcast %c7_i32_13 : i32 to vector<1x128xi32>
    %39 = arith.minsi %37, %38 : vector<1x128xi32>
    %c1_i32_14 = arith.constant 1 : i32
    %40 = vector.broadcast %c1_i32_14 : i32 to vector<1x128xi32>
    %41 = arith.addi %35, %40 : vector<1x128xi32>
    %c7_i32_15 = arith.constant 7 : i32
    %42 = vector.broadcast %c7_i32_15 : i32 to vector<1x128xi32>
    %43 = arith.minsi %41, %42 : vector<1x128xi32>
    %cst_16 = arith.constant 1.000000e+00 : f32
    %44 = vector.broadcast %cst_16 : f32 to vector<1x128xf32>
    %45 = arith.subf %44, %32 : vector<1x128xf32>
    %cst_17 = arith.constant 1.000000e+00 : f32
    %46 = vector.broadcast %cst_17 : f32 to vector<1x128xf32>
    %47 = arith.subf %46, %33 : vector<1x128xf32>
    %48 = arith.mulf %45, %47 : vector<1x128xf32>
    %c8_i32 = arith.constant 8 : i32
    %49 = vector.broadcast %c8_i32 : i32 to vector<1x128xi32>
    %50 = arith.muli %35, %49 : vector<1x128xi32>
    %51 = arith.addi %50, %34 : vector<1x128xi32>
    %52 = vector.broadcast %51 : vector<1x128xi32> to vector<64x128xi32>
    %53 = arith.cmpi eq, %5, %52 : vector<64x128xi32>
    %cst_18 = arith.constant 0.000000e+00 : f32
    %54 = vector.shape_cast %48 : vector<1x128xf32> to vector<1x128xf32>
    %55 = vector.broadcast %54 : vector<1x128xf32> to vector<64x128xf32>
    %56 = vector.broadcast %cst_18 : f32 to vector<64x128xf32>
    %57 = arith.select %53, %55, %56 : vector<64x128xi1>, vector<64x128xf32>
    %cst_19 = arith.constant 1.000000e+00 : f32
    %58 = vector.broadcast %cst_19 : f32 to vector<1x128xf32>
    %59 = arith.subf %58, %33 : vector<1x128xf32>
    %60 = arith.mulf %32, %59 : vector<1x128xf32>
    %c8_i32_20 = arith.constant 8 : i32
    %61 = vector.broadcast %c8_i32_20 : i32 to vector<1x128xi32>
    %62 = arith.muli %35, %61 : vector<1x128xi32>
    %63 = arith.addi %62, %39 : vector<1x128xi32>
    %64 = vector.broadcast %63 : vector<1x128xi32> to vector<64x128xi32>
    %65 = arith.cmpi eq, %5, %64 : vector<64x128xi32>
    %cst_21 = arith.constant 0.000000e+00 : f32
    %66 = vector.shape_cast %60 : vector<1x128xf32> to vector<1x128xf32>
    %67 = vector.broadcast %66 : vector<1x128xf32> to vector<64x128xf32>
    %68 = vector.broadcast %cst_21 : f32 to vector<64x128xf32>
    %69 = arith.select %65, %67, %68 : vector<64x128xi1>, vector<64x128xf32>
    %70 = arith.addf %57, %69 : vector<64x128xf32>
    %cst_22 = arith.constant 1.000000e+00 : f32
    %71 = vector.broadcast %cst_22 : f32 to vector<1x128xf32>
    %72 = arith.subf %71, %32 : vector<1x128xf32>
    %73 = arith.mulf %72, %33 : vector<1x128xf32>
    %c8_i32_23 = arith.constant 8 : i32
    %74 = vector.broadcast %c8_i32_23 : i32 to vector<1x128xi32>
    %75 = arith.muli %43, %74 : vector<1x128xi32>
    %76 = arith.addi %75, %34 : vector<1x128xi32>
    %77 = vector.broadcast %76 : vector<1x128xi32> to vector<64x128xi32>
    %78 = arith.cmpi eq, %5, %77 : vector<64x128xi32>
    %cst_24 = arith.constant 0.000000e+00 : f32
    %79 = vector.shape_cast %73 : vector<1x128xf32> to vector<1x128xf32>
    %80 = vector.broadcast %79 : vector<1x128xf32> to vector<64x128xf32>
    %81 = vector.broadcast %cst_24 : f32 to vector<64x128xf32>
    %82 = arith.select %78, %80, %81 : vector<64x128xi1>, vector<64x128xf32>
    %83 = arith.addf %70, %82 : vector<64x128xf32>
    %84 = arith.mulf %32, %33 : vector<1x128xf32>
    %c8_i32_25 = arith.constant 8 : i32
    %85 = vector.broadcast %c8_i32_25 : i32 to vector<1x128xi32>
    %86 = arith.muli %43, %85 : vector<1x128xi32>
    %87 = arith.addi %86, %39 : vector<1x128xi32>
    %88 = vector.broadcast %87 : vector<1x128xi32> to vector<64x128xi32>
    %89 = arith.cmpi eq, %5, %88 : vector<64x128xi32>
    %cst_26 = arith.constant 0.000000e+00 : f32
    %90 = vector.shape_cast %84 : vector<1x128xf32> to vector<1x128xf32>
    %91 = vector.broadcast %90 : vector<1x128xf32> to vector<64x128xf32>
    %92 = vector.broadcast %cst_26 : f32 to vector<64x128xf32>
    %93 = arith.select %89, %91, %92 : vector<64x128xi1>, vector<64x128xf32>
    %94 = arith.addf %83, %93 : vector<64x128xf32>
    %cst_27 = arith.constant dense<0.000000e+00> : vector<48x128xf32>
    %95 = tpu.matmul %7, %94, %cst_27 {dimension_numbers = #tpu.dot_dimension_numbers<[1], [0], [0], [1], [0, 0, 1, 1], [], []>} : vector<48x64xf32>, vector<64x128xf32>, vector<48x128xf32> -> vector<48x128xf32>
    %c0_28 = arith.constant 0 : index
    %c0_29 = arith.constant 0 : index
    %c0_30 = arith.constant 0 : index
    %96 = vector.load %arg4[%c0_28, %c0_29, %c0_30] : memref<1x48x64xf32, #tpu.memory_space<vmem>>, vector<1x48x64xf32>
    %97 = vector.shape_cast %96 : vector<1x48x64xf32> to vector<48x64xf32>
    %cst_31 = arith.constant 1.000000e+00 : f32
    %98 = vector.broadcast %cst_31 : f32 to vector<1x128xf32>
    %99 = arith.addf %3, %98 : vector<1x128xf32>
    %cst_32 = arith.constant 5.000000e-01 : f32
    %100 = vector.broadcast %cst_32 : f32 to vector<1x128xf32>
    %101 = arith.mulf %99, %100 : vector<1x128xf32>
    %cst_33 = arith.constant 7.000000e+00 : f32
    %102 = vector.broadcast %cst_33 : f32 to vector<1x128xf32>
    %103 = arith.mulf %101, %102 : vector<1x128xf32>
    %cst_34 = arith.constant 0.000000e+00 : f32
    %c7_i32_35 = arith.constant 7 : i32
    %104 = vector.broadcast %cst_34 : f32 to vector<1x128xf32>
    %105 = arith.maximumf %104, %103 : vector<1x128xf32>
    %106 = arith.sitofp %c7_i32_35 : i32 to f32
    %107 = vector.broadcast %106 : f32 to vector<1x128xf32>
    %108 = arith.minimumf %107, %105 : vector<1x128xf32>
    %cst_36 = arith.constant 1.000000e+00 : f32
    %109 = vector.broadcast %cst_36 : f32 to vector<1x128xf32>
    %110 = arith.addf %4, %109 : vector<1x128xf32>
    %cst_37 = arith.constant 5.000000e-01 : f32
    %111 = vector.broadcast %cst_37 : f32 to vector<1x128xf32>
    %112 = arith.mulf %110, %111 : vector<1x128xf32>
    %cst_38 = arith.constant 7.000000e+00 : f32
    %113 = vector.broadcast %cst_38 : f32 to vector<1x128xf32>
    %114 = arith.mulf %112, %113 : vector<1x128xf32>
    %cst_39 = arith.constant 0.000000e+00 : f32
    %c7_i32_40 = arith.constant 7 : i32
    %115 = vector.broadcast %cst_39 : f32 to vector<1x128xf32>
    %116 = arith.maximumf %115, %114 : vector<1x128xf32>
    %117 = arith.sitofp %c7_i32_40 : i32 to f32
    %118 = vector.broadcast %117 : f32 to vector<1x128xf32>
    %119 = arith.minimumf %118, %116 : vector<1x128xf32>
    %120 = math.floor %108 : vector<1x128xf32>
    %121 = math.floor %119 : vector<1x128xf32>
    %122 = arith.subf %108, %120 : vector<1x128xf32>
    %123 = arith.subf %119, %121 : vector<1x128xf32>
    %124 = arith.fptosi %120 : vector<1x128xf32> to vector<1x128xi32>
    %125 = arith.fptosi %121 : vector<1x128xf32> to vector<1x128xi32>
    %c1_i32_41 = arith.constant 1 : i32
    %126 = vector.broadcast %c1_i32_41 : i32 to vector<1x128xi32>
    %127 = arith.addi %124, %126 : vector<1x128xi32>
    %c7_i32_42 = arith.constant 7 : i32
    %128 = vector.broadcast %c7_i32_42 : i32 to vector<1x128xi32>
    %129 = arith.minsi %127, %128 : vector<1x128xi32>
    %c1_i32_43 = arith.constant 1 : i32
    %130 = vector.broadcast %c1_i32_43 : i32 to vector<1x128xi32>
    %131 = arith.addi %125, %130 : vector<1x128xi32>
    %c7_i32_44 = arith.constant 7 : i32
    %132 = vector.broadcast %c7_i32_44 : i32 to vector<1x128xi32>
    %133 = arith.minsi %131, %132 : vector<1x128xi32>
    %cst_45 = arith.constant 1.000000e+00 : f32
    %134 = vector.broadcast %cst_45 : f32 to vector<1x128xf32>
    %135 = arith.subf %134, %122 : vector<1x128xf32>
    %cst_46 = arith.constant 1.000000e+00 : f32
    %136 = vector.broadcast %cst_46 : f32 to vector<1x128xf32>
    %137 = arith.subf %136, %123 : vector<1x128xf32>
    %138 = arith.mulf %135, %137 : vector<1x128xf32>
    %c8_i32_47 = arith.constant 8 : i32
    %139 = vector.broadcast %c8_i32_47 : i32 to vector<1x128xi32>
    %140 = arith.muli %125, %139 : vector<1x128xi32>
    %141 = arith.addi %140, %124 : vector<1x128xi32>
    %142 = vector.broadcast %141 : vector<1x128xi32> to vector<64x128xi32>
    %143 = arith.cmpi eq, %5, %142 : vector<64x128xi32>
    %cst_48 = arith.constant 0.000000e+00 : f32
    %144 = vector.shape_cast %138 : vector<1x128xf32> to vector<1x128xf32>
    %145 = vector.broadcast %144 : vector<1x128xf32> to vector<64x128xf32>
    %146 = vector.broadcast %cst_48 : f32 to vector<64x128xf32>
    %147 = arith.select %143, %145, %146 : vector<64x128xi1>, vector<64x128xf32>
    %cst_49 = arith.constant 1.000000e+00 : f32
    %148 = vector.broadcast %cst_49 : f32 to vector<1x128xf32>
    %149 = arith.subf %148, %123 : vector<1x128xf32>
    %150 = arith.mulf %122, %149 : vector<1x128xf32>
    %c8_i32_50 = arith.constant 8 : i32
    %151 = vector.broadcast %c8_i32_50 : i32 to vector<1x128xi32>
    %152 = arith.muli %125, %151 : vector<1x128xi32>
    %153 = arith.addi %152, %129 : vector<1x128xi32>
    %154 = vector.broadcast %153 : vector<1x128xi32> to vector<64x128xi32>
    %155 = arith.cmpi eq, %5, %154 : vector<64x128xi32>
    %cst_51 = arith.constant 0.000000e+00 : f32
    %156 = vector.shape_cast %150 : vector<1x128xf32> to vector<1x128xf32>
    %157 = vector.broadcast %156 : vector<1x128xf32> to vector<64x128xf32>
    %158 = vector.broadcast %cst_51 : f32 to vector<64x128xf32>
    %159 = arith.select %155, %157, %158 : vector<64x128xi1>, vector<64x128xf32>
    %160 = arith.addf %147, %159 : vector<64x128xf32>
    %cst_52 = arith.constant 1.000000e+00 : f32
    %161 = vector.broadcast %cst_52 : f32 to vector<1x128xf32>
    %162 = arith.subf %161, %122 : vector<1x128xf32>
    %163 = arith.mulf %162, %123 : vector<1x128xf32>
    %c8_i32_53 = arith.constant 8 : i32
    %164 = vector.broadcast %c8_i32_53 : i32 to vector<1x128xi32>
    %165 = arith.muli %133, %164 : vector<1x128xi32>
    %166 = arith.addi %165, %124 : vector<1x128xi32>
    %167 = vector.broadcast %166 : vector<1x128xi32> to vector<64x128xi32>
    %168 = arith.cmpi eq, %5, %167 : vector<64x128xi32>
    %cst_54 = arith.constant 0.000000e+00 : f32
    %169 = vector.shape_cast %163 : vector<1x128xf32> to vector<1x128xf32>
    %170 = vector.broadcast %169 : vector<1x128xf32> to vector<64x128xf32>
    %171 = vector.broadcast %cst_54 : f32 to vector<64x128xf32>
    %172 = arith.select %168, %170, %171 : vector<64x128xi1>, vector<64x128xf32>
    %173 = arith.addf %160, %172 : vector<64x128xf32>
    %174 = arith.mulf %122, %123 : vector<1x128xf32>
    %c8_i32_55 = arith.constant 8 : i32
    %175 = vector.broadcast %c8_i32_55 : i32 to vector<1x128xi32>
    %176 = arith.muli %133, %175 : vector<1x128xi32>
    %177 = arith.addi %176, %129 : vector<1x128xi32>
    %178 = vector.broadcast %177 : vector<1x128xi32> to vector<64x128xi32>
    %179 = arith.cmpi eq, %5, %178 : vector<64x128xi32>
    %cst_56 = arith.constant 0.000000e+00 : f32
    %180 = vector.shape_cast %174 : vector<1x128xf32> to vector<1x128xf32>
    %181 = vector.broadcast %180 : vector<1x128xf32> to vector<64x128xf32>
    %182 = vector.broadcast %cst_56 : f32 to vector<64x128xf32>
    %183 = arith.select %179, %181, %182 : vector<64x128xi1>, vector<64x128xf32>
    %184 = arith.addf %173, %183 : vector<64x128xf32>
    %cst_57 = arith.constant dense<0.000000e+00> : vector<48x128xf32>
    %185 = tpu.matmul %97, %184, %cst_57 {dimension_numbers = #tpu.dot_dimension_numbers<[1], [0], [0], [1], [0, 0, 1, 1], [], []>} : vector<48x64xf32>, vector<64x128xf32>, vector<48x128xf32> -> vector<48x128xf32>
    %186 = arith.addf %95, %185 : vector<48x128xf32>
    %c0_58 = arith.constant 0 : index
    %c0_59 = arith.constant 0 : index
    %c0_60 = arith.constant 0 : index
    %187 = vector.load %arg5[%c0_58, %c0_59, %c0_60] : memref<1x48x64xf32, #tpu.memory_space<vmem>>, vector<1x48x64xf32>
    %188 = vector.shape_cast %187 : vector<1x48x64xf32> to vector<48x64xf32>
    %cst_61 = arith.constant 1.000000e+00 : f32
    %189 = vector.broadcast %cst_61 : f32 to vector<1x128xf32>
    %190 = arith.addf %2, %189 : vector<1x128xf32>
    %cst_62 = arith.constant 5.000000e-01 : f32
    %191 = vector.broadcast %cst_62 : f32 to vector<1x128xf32>
    %192 = arith.mulf %190, %191 : vector<1x128xf32>
    %cst_63 = arith.constant 7.000000e+00 : f32
    %193 = vector.broadcast %cst_63 : f32 to vector<1x128xf32>
    %194 = arith.mulf %192, %193 : vector<1x128xf32>
    %cst_64 = arith.constant 0.000000e+00 : f32
    %c7_i32_65 = arith.constant 7 : i32
    %195 = vector.broadcast %cst_64 : f32 to vector<1x128xf32>
    %196 = arith.maximumf %195, %194 : vector<1x128xf32>
    %197 = arith.sitofp %c7_i32_65 : i32 to f32
    %198 = vector.broadcast %197 : f32 to vector<1x128xf32>
    %199 = arith.minimumf %198, %196 : vector<1x128xf32>
    %cst_66 = arith.constant 1.000000e+00 : f32
    %200 = vector.broadcast %cst_66 : f32 to vector<1x128xf32>
    %201 = arith.addf %4, %200 : vector<1x128xf32>
    %cst_67 = arith.constant 5.000000e-01 : f32
    %202 = vector.broadcast %cst_67 : f32 to vector<1x128xf32>
    %203 = arith.mulf %201, %202 : vector<1x128xf32>
    %cst_68 = arith.constant 7.000000e+00 : f32
    %204 = vector.broadcast %cst_68 : f32 to vector<1x128xf32>
    %205 = arith.mulf %203, %204 : vector<1x128xf32>
    %cst_69 = arith.constant 0.000000e+00 : f32
    %c7_i32_70 = arith.constant 7 : i32
    %206 = vector.broadcast %cst_69 : f32 to vector<1x128xf32>
    %207 = arith.maximumf %206, %205 : vector<1x128xf32>
    %208 = arith.sitofp %c7_i32_70 : i32 to f32
    %209 = vector.broadcast %208 : f32 to vector<1x128xf32>
    %210 = arith.minimumf %209, %207 : vector<1x128xf32>
    %211 = math.floor %199 : vector<1x128xf32>
    %212 = math.floor %210 : vector<1x128xf32>
    %213 = arith.subf %199, %211 : vector<1x128xf32>
    %214 = arith.subf %210, %212 : vector<1x128xf32>
    %215 = arith.fptosi %211 : vector<1x128xf32> to vector<1x128xi32>
    %216 = arith.fptosi %212 : vector<1x128xf32> to vector<1x128xi32>
    %c1_i32_71 = arith.constant 1 : i32
    %217 = vector.broadcast %c1_i32_71 : i32 to vector<1x128xi32>
    %218 = arith.addi %215, %217 : vector<1x128xi32>
    %c7_i32_72 = arith.constant 7 : i32
    %219 = vector.broadcast %c7_i32_72 : i32 to vector<1x128xi32>
    %220 = arith.minsi %218, %219 : vector<1x128xi32>
    %c1_i32_73 = arith.constant 1 : i32
    %221 = vector.broadcast %c1_i32_73 : i32 to vector<1x128xi32>
    %222 = arith.addi %216, %221 : vector<1x128xi32>
    %c7_i32_74 = arith.constant 7 : i32
    %223 = vector.broadcast %c7_i32_74 : i32 to vector<1x128xi32>
    %224 = arith.minsi %222, %223 : vector<1x128xi32>
    %cst_75 = arith.constant 1.000000e+00 : f32
    %225 = vector.broadcast %cst_75 : f32 to vector<1x128xf32>
    %226 = arith.subf %225, %213 : vector<1x128xf32>
    %cst_76 = arith.constant 1.000000e+00 : f32
    %227 = vector.broadcast %cst_76 : f32 to vector<1x128xf32>
    %228 = arith.subf %227, %214 : vector<1x128xf32>
    %229 = arith.mulf %226, %228 : vector<1x128xf32>
    %c8_i32_77 = arith.constant 8 : i32
    %230 = vector.broadcast %c8_i32_77 : i32 to vector<1x128xi32>
    %231 = arith.muli %216, %230 : vector<1x128xi32>
    %232 = arith.addi %231, %215 : vector<1x128xi32>
    %233 = vector.broadcast %232 : vector<1x128xi32> to vector<64x128xi32>
    %234 = arith.cmpi eq, %5, %233 : vector<64x128xi32>
    %cst_78 = arith.constant 0.000000e+00 : f32
    %235 = vector.shape_cast %229 : vector<1x128xf32> to vector<1x128xf32>
    %236 = vector.broadcast %235 : vector<1x128xf32> to vector<64x128xf32>
    %237 = vector.broadcast %cst_78 : f32 to vector<64x128xf32>
    %238 = arith.select %234, %236, %237 : vector<64x128xi1>, vector<64x128xf32>
    %cst_79 = arith.constant 1.000000e+00 : f32
    %239 = vector.broadcast %cst_79 : f32 to vector<1x128xf32>
    %240 = arith.subf %239, %214 : vector<1x128xf32>
    %241 = arith.mulf %213, %240 : vector<1x128xf32>
    %c8_i32_80 = arith.constant 8 : i32
    %242 = vector.broadcast %c8_i32_80 : i32 to vector<1x128xi32>
    %243 = arith.muli %216, %242 : vector<1x128xi32>
    %244 = arith.addi %243, %220 : vector<1x128xi32>
    %245 = vector.broadcast %244 : vector<1x128xi32> to vector<64x128xi32>
    %246 = arith.cmpi eq, %5, %245 : vector<64x128xi32>
    %cst_81 = arith.constant 0.000000e+00 : f32
    %247 = vector.shape_cast %241 : vector<1x128xf32> to vector<1x128xf32>
    %248 = vector.broadcast %247 : vector<1x128xf32> to vector<64x128xf32>
    %249 = vector.broadcast %cst_81 : f32 to vector<64x128xf32>
    %250 = arith.select %246, %248, %249 : vector<64x128xi1>, vector<64x128xf32>
    %251 = arith.addf %238, %250 : vector<64x128xf32>
    %cst_82 = arith.constant 1.000000e+00 : f32
    %252 = vector.broadcast %cst_82 : f32 to vector<1x128xf32>
    %253 = arith.subf %252, %213 : vector<1x128xf32>
    %254 = arith.mulf %253, %214 : vector<1x128xf32>
    %c8_i32_83 = arith.constant 8 : i32
    %255 = vector.broadcast %c8_i32_83 : i32 to vector<1x128xi32>
    %256 = arith.muli %224, %255 : vector<1x128xi32>
    %257 = arith.addi %256, %215 : vector<1x128xi32>
    %258 = vector.broadcast %257 : vector<1x128xi32> to vector<64x128xi32>
    %259 = arith.cmpi eq, %5, %258 : vector<64x128xi32>
    %cst_84 = arith.constant 0.000000e+00 : f32
    %260 = vector.shape_cast %254 : vector<1x128xf32> to vector<1x128xf32>
    %261 = vector.broadcast %260 : vector<1x128xf32> to vector<64x128xf32>
    %262 = vector.broadcast %cst_84 : f32 to vector<64x128xf32>
    %263 = arith.select %259, %261, %262 : vector<64x128xi1>, vector<64x128xf32>
    %264 = arith.addf %251, %263 : vector<64x128xf32>
    %265 = arith.mulf %213, %214 : vector<1x128xf32>
    %c8_i32_85 = arith.constant 8 : i32
    %266 = vector.broadcast %c8_i32_85 : i32 to vector<1x128xi32>
    %267 = arith.muli %224, %266 : vector<1x128xi32>
    %268 = arith.addi %267, %220 : vector<1x128xi32>
    %269 = vector.broadcast %268 : vector<1x128xi32> to vector<64x128xi32>
    %270 = arith.cmpi eq, %5, %269 : vector<64x128xi32>
    %cst_86 = arith.constant 0.000000e+00 : f32
    %271 = vector.shape_cast %265 : vector<1x128xf32> to vector<1x128xf32>
    %272 = vector.broadcast %271 : vector<1x128xf32> to vector<64x128xf32>
    %273 = vector.broadcast %cst_86 : f32 to vector<64x128xf32>
    %274 = arith.select %270, %272, %273 : vector<64x128xi1>, vector<64x128xf32>
    %275 = arith.addf %264, %274 : vector<64x128xf32>
    %cst_87 = arith.constant dense<0.000000e+00> : vector<48x128xf32>
    %276 = tpu.matmul %188, %275, %cst_87 {dimension_numbers = #tpu.dot_dimension_numbers<[1], [0], [0], [1], [0, 0, 1, 1], [], []>} : vector<48x64xf32>, vector<64x128xf32>, vector<48x128xf32> -> vector<48x128xf32>
    %277 = arith.addf %186, %276 : vector<48x128xf32>
    %278 = vector.extract_strided_slice %277 {offsets = [0, 0], sizes = [16, 128], strides = [1, 1]} : vector<48x128xf32> to vector<16x128xf32>
    %279 = vector.extract_strided_slice %277 {offsets = [16, 0], sizes = [16, 128], strides = [1, 1]} : vector<48x128xf32> to vector<16x128xf32>
    %280 = vector.extract_strided_slice %277 {offsets = [32, 0], sizes = [16, 128], strides = [1, 1]} : vector<48x128xf32> to vector<16x128xf32>
    %c32 = arith.constant 32 : index
    %c0_88 = arith.constant 0 : index
    %281 = vector.load %arg6[%c32, %c0_88] : memref<504x32xf32, #tpu.memory_space<vmem>>, vector<16x16xf32>
    %cst_89 = arith.constant 0.000000e+00 : f32
    %282 = vector.broadcast %cst_89 : f32 to vector<16x128xf32>
    %283 = arith.maximumf %278, %282 : vector<16x128xf32>
    %cst_90 = arith.constant dense<0.000000e+00> : vector<16x128xf32>
    %284 = tpu.matmul %281, %283, %cst_90 {dimension_numbers = #tpu.dot_dimension_numbers<[1], [0], [0], [1], [0, 0, 1, 1], [], []>} : vector<16x16xf32>, vector<16x128xf32>, vector<16x128xf32> -> vector<16x128xf32>
    %c32_91 = arith.constant 32 : index
    %c0_92 = arith.constant 0 : index
    %285 = vector.load %arg7[%c32_91, %c0_92] : memref<504x1xf32, #tpu.memory_space<vmem>>, vector<16x1xf32>
    %286 = vector.broadcast %285 : vector<16x1xf32> to vector<16x128xf32>
    %287 = arith.addf %284, %286 : vector<16x128xf32>
    %cst_93 = arith.constant 0.000000e+00 : f32
    %288 = vector.broadcast %cst_93 : f32 to vector<16x128xf32>
    %289 = arith.maximumf %287, %288 : vector<16x128xf32>
    %c0_94 = arith.constant 0 : index
    %c0_95 = arith.constant 0 : index
    %290 = vector.load %arg6[%c0_94, %c0_95] : memref<504x32xf32, #tpu.memory_space<vmem>>, vector<32x8xf32>
    %cst_96 = arith.constant dense<0.000000e+00> : vector<32x128xf32>
    %291 = tpu.matmul %290, %1, %cst_96 {dimension_numbers = #tpu.dot_dimension_numbers<[1], [0], [0], [1], [0, 0, 1, 1], [], []>} : vector<32x8xf32>, vector<8x128xf32>, vector<32x128xf32> -> vector<32x128xf32>
    %c80 = arith.constant 80 : index
    %c0_97 = arith.constant 0 : index
    %292 = vector.load %arg6[%c80, %c0_97] : memref<504x32xf32, #tpu.memory_space<vmem>>, vector<32x16xf32>
    %cst_98 = arith.constant dense<0.000000e+00> : vector<32x128xf32>
    %293 = tpu.matmul %292, %278, %cst_98 {dimension_numbers = #tpu.dot_dimension_numbers<[1], [0], [0], [1], [0, 0, 1, 1], [], []>} : vector<32x16xf32>, vector<16x128xf32>, vector<32x128xf32> -> vector<32x128xf32>
    %294 = arith.addf %291, %293 : vector<32x128xf32>
    %c48 = arith.constant 48 : index
    %c0_99 = arith.constant 0 : index
    %295 = vector.load %arg6[%c48, %c0_99] : memref<504x32xf32, #tpu.memory_space<vmem>>, vector<32x16xf32>
    %cst_100 = arith.constant dense<0.000000e+00> : vector<32x128xf32>
    %296 = tpu.matmul %295, %289, %cst_100 {dimension_numbers = #tpu.dot_dimension_numbers<[1], [0], [0], [1], [0, 0, 1, 1], [], []>} : vector<32x16xf32>, vector<16x128xf32>, vector<32x128xf32> -> vector<32x128xf32>
    %297 = arith.addf %294, %296 : vector<32x128xf32>
    %c48_101 = arith.constant 48 : index
    %c0_102 = arith.constant 0 : index
    %298 = vector.load %arg7[%c48_101, %c0_102] : memref<504x1xf32, #tpu.memory_space<vmem>>, vector<32x1xf32>
    %299 = vector.broadcast %298 : vector<32x1xf32> to vector<32x128xf32>
    %300 = arith.addf %297, %299 : vector<32x128xf32>
    %c112 = arith.constant 112 : index
    %c0_103 = arith.constant 0 : index
    %301 = vector.load %arg6[%c112, %c0_103] : memref<504x32xf32, #tpu.memory_space<vmem>>, vector<32x32xf32>
    %cst_104 = arith.constant 0.000000e+00 : f32
    %302 = vector.broadcast %cst_104 : f32 to vector<32x128xf32>
    %303 = arith.maximumf %300, %302 : vector<32x128xf32>
    %cst_105 = arith.constant dense<0.000000e+00> : vector<32x128xf32>
    %304 = tpu.matmul %301, %303, %cst_105 {dimension_numbers = #tpu.dot_dimension_numbers<[1], [0], [0], [1], [0, 0, 1, 1], [], []>} : vector<32x32xf32>, vector<32x128xf32>, vector<32x128xf32> -> vector<32x128xf32>
    %c144 = arith.constant 144 : index
    %c0_106 = arith.constant 0 : index
    %305 = vector.load %arg6[%c144, %c0_106] : memref<504x32xf32, #tpu.memory_space<vmem>>, vector<32x16xf32>
    %cst_107 = arith.constant 0.000000e+00 : f32
    %306 = vector.broadcast %cst_107 : f32 to vector<16x128xf32>
    %307 = arith.maximumf %279, %306 : vector<16x128xf32>
    %cst_108 = arith.constant dense<0.000000e+00> : vector<32x128xf32>
    %308 = tpu.matmul %305, %307, %cst_108 {dimension_numbers = #tpu.dot_dimension_numbers<[1], [0], [0], [1], [0, 0, 1, 1], [], []>} : vector<32x16xf32>, vector<16x128xf32>, vector<32x128xf32> -> vector<32x128xf32>
    %309 = arith.addf %304, %308 : vector<32x128xf32>
    %c112_109 = arith.constant 112 : index
    %c0_110 = arith.constant 0 : index
    %310 = vector.load %arg7[%c112_109, %c0_110] : memref<504x1xf32, #tpu.memory_space<vmem>>, vector<32x1xf32>
    %311 = vector.broadcast %310 : vector<32x1xf32> to vector<32x128xf32>
    %312 = arith.addf %309, %311 : vector<32x128xf32>
    %cst_111 = arith.constant 0.000000e+00 : f32
    %313 = vector.broadcast %cst_111 : f32 to vector<32x128xf32>
    %314 = arith.maximumf %312, %313 : vector<32x128xf32>
    %c208 = arith.constant 208 : index
    %c0_112 = arith.constant 0 : index
    %315 = vector.load %arg6[%c208, %c0_112] : memref<504x32xf32, #tpu.memory_space<vmem>>, vector<32x32xf32>
    %cst_113 = arith.constant dense<0.000000e+00> : vector<32x128xf32>
    %316 = tpu.matmul %315, %300, %cst_113 {dimension_numbers = #tpu.dot_dimension_numbers<[1], [0], [0], [1], [0, 0, 1, 1], [], []>} : vector<32x32xf32>, vector<32x128xf32>, vector<32x128xf32> -> vector<32x128xf32>
    %c240 = arith.constant 240 : index
    %c0_114 = arith.constant 0 : index
    %317 = vector.load %arg6[%c240, %c0_114] : memref<504x32xf32, #tpu.memory_space<vmem>>, vector<32x16xf32>
    %cst_115 = arith.constant dense<0.000000e+00> : vector<32x128xf32>
    %318 = tpu.matmul %317, %279, %cst_115 {dimension_numbers = #tpu.dot_dimension_numbers<[1], [0], [0], [1], [0, 0, 1, 1], [], []>} : vector<32x16xf32>, vector<16x128xf32>, vector<32x128xf32> -> vector<32x128xf32>
    %319 = arith.addf %316, %318 : vector<32x128xf32>
    %c176 = arith.constant 176 : index
    %c0_116 = arith.constant 0 : index
    %320 = vector.load %arg6[%c176, %c0_116] : memref<504x32xf32, #tpu.memory_space<vmem>>, vector<32x32xf32>
    %cst_117 = arith.constant dense<0.000000e+00> : vector<32x128xf32>
    %321 = tpu.matmul %320, %314, %cst_117 {dimension_numbers = #tpu.dot_dimension_numbers<[1], [0], [0], [1], [0, 0, 1, 1], [], []>} : vector<32x32xf32>, vector<32x128xf32>, vector<32x128xf32> -> vector<32x128xf32>
    %322 = arith.addf %319, %321 : vector<32x128xf32>
    %c176_118 = arith.constant 176 : index
    %c0_119 = arith.constant 0 : index
    %323 = vector.load %arg7[%c176_118, %c0_119] : memref<504x1xf32, #tpu.memory_space<vmem>>, vector<32x1xf32>
    %324 = vector.broadcast %323 : vector<32x1xf32> to vector<32x128xf32>
    %325 = arith.addf %322, %324 : vector<32x128xf32>
    %c272 = arith.constant 272 : index
    %c0_120 = arith.constant 0 : index
    %326 = vector.load %arg6[%c272, %c0_120] : memref<504x32xf32, #tpu.memory_space<vmem>>, vector<32x32xf32>
    %cst_121 = arith.constant 0.000000e+00 : f32
    %327 = vector.broadcast %cst_121 : f32 to vector<32x128xf32>
    %328 = arith.maximumf %325, %327 : vector<32x128xf32>
    %cst_122 = arith.constant dense<0.000000e+00> : vector<32x128xf32>
    %329 = tpu.matmul %326, %328, %cst_122 {dimension_numbers = #tpu.dot_dimension_numbers<[1], [0], [0], [1], [0, 0, 1, 1], [], []>} : vector<32x32xf32>, vector<32x128xf32>, vector<32x128xf32> -> vector<32x128xf32>
    %c304 = arith.constant 304 : index
    %c0_123 = arith.constant 0 : index
    %330 = vector.load %arg6[%c304, %c0_123] : memref<504x32xf32, #tpu.memory_space<vmem>>, vector<32x16xf32>
    %cst_124 = arith.constant 0.000000e+00 : f32
    %331 = vector.broadcast %cst_124 : f32 to vector<16x128xf32>
    %332 = arith.maximumf %280, %331 : vector<16x128xf32>
    %cst_125 = arith.constant dense<0.000000e+00> : vector<32x128xf32>
    %333 = tpu.matmul %330, %332, %cst_125 {dimension_numbers = #tpu.dot_dimension_numbers<[1], [0], [0], [1], [0, 0, 1, 1], [], []>} : vector<32x16xf32>, vector<16x128xf32>, vector<32x128xf32> -> vector<32x128xf32>
    %334 = arith.addf %329, %333 : vector<32x128xf32>
    %c272_126 = arith.constant 272 : index
    %c0_127 = arith.constant 0 : index
    %335 = vector.load %arg7[%c272_126, %c0_127] : memref<504x1xf32, #tpu.memory_space<vmem>>, vector<32x1xf32>
    %336 = vector.broadcast %335 : vector<32x1xf32> to vector<32x128xf32>
    %337 = arith.addf %334, %336 : vector<32x128xf32>
    %cst_128 = arith.constant 0.000000e+00 : f32
    %338 = vector.broadcast %cst_128 : f32 to vector<32x128xf32>
    %339 = arith.maximumf %337, %338 : vector<32x128xf32>
    %c368 = arith.constant 368 : index
    %c0_129 = arith.constant 0 : index
    %340 = vector.load %arg6[%c368, %c0_129] : memref<504x32xf32, #tpu.memory_space<vmem>>, vector<32x32xf32>
    %cst_130 = arith.constant dense<0.000000e+00> : vector<32x128xf32>
    %341 = tpu.matmul %340, %325, %cst_130 {dimension_numbers = #tpu.dot_dimension_numbers<[1], [0], [0], [1], [0, 0, 1, 1], [], []>} : vector<32x32xf32>, vector<32x128xf32>, vector<32x128xf32> -> vector<32x128xf32>
    %c400 = arith.constant 400 : index
    %c0_131 = arith.constant 0 : index
    %342 = vector.load %arg6[%c400, %c0_131] : memref<504x32xf32, #tpu.memory_space<vmem>>, vector<32x16xf32>
    %cst_132 = arith.constant dense<0.000000e+00> : vector<32x128xf32>
    %343 = tpu.matmul %342, %280, %cst_132 {dimension_numbers = #tpu.dot_dimension_numbers<[1], [0], [0], [1], [0, 0, 1, 1], [], []>} : vector<32x16xf32>, vector<16x128xf32>, vector<32x128xf32> -> vector<32x128xf32>
    %344 = arith.addf %341, %343 : vector<32x128xf32>
    %c336 = arith.constant 336 : index
    %c0_133 = arith.constant 0 : index
    %345 = vector.load %arg6[%c336, %c0_133] : memref<504x32xf32, #tpu.memory_space<vmem>>, vector<32x32xf32>
    %cst_134 = arith.constant dense<0.000000e+00> : vector<32x128xf32>
    %346 = tpu.matmul %345, %339, %cst_134 {dimension_numbers = #tpu.dot_dimension_numbers<[1], [0], [0], [1], [0, 0, 1, 1], [], []>} : vector<32x32xf32>, vector<32x128xf32>, vector<32x128xf32> -> vector<32x128xf32>
    %347 = arith.addf %344, %346 : vector<32x128xf32>
    %c336_135 = arith.constant 336 : index
    %c0_136 = arith.constant 0 : index
    %348 = vector.load %arg7[%c336_135, %c0_136] : memref<504x1xf32, #tpu.memory_space<vmem>>, vector<32x1xf32>
    %349 = vector.broadcast %348 : vector<32x1xf32> to vector<32x128xf32>
    %350 = arith.addf %347, %349 : vector<32x128xf32>
    %c432 = arith.constant 432 : index
    %c0_137 = arith.constant 0 : index
    %351 = vector.load %arg6[%c432, %c0_137] : memref<504x32xf32, #tpu.memory_space<vmem>>, vector<32x32xf32>
    %cst_138 = arith.constant 0.000000e+00 : f32
    %352 = vector.broadcast %cst_138 : f32 to vector<32x128xf32>
    %353 = arith.maximumf %350, %352 : vector<32x128xf32>
    %cst_139 = arith.constant dense<0.000000e+00> : vector<32x128xf32>
    %354 = tpu.matmul %351, %353, %cst_139 {dimension_numbers = #tpu.dot_dimension_numbers<[1], [0], [0], [1], [0, 0, 1, 1], [], []>} : vector<32x32xf32>, vector<32x128xf32>, vector<32x128xf32> -> vector<32x128xf32>
    %c432_140 = arith.constant 432 : index
    %c0_141 = arith.constant 0 : index
    %355 = vector.load %arg7[%c432_140, %c0_141] : memref<504x1xf32, #tpu.memory_space<vmem>>, vector<32x1xf32>
    %356 = vector.broadcast %355 : vector<32x1xf32> to vector<32x128xf32>
    %357 = arith.addf %354, %356 : vector<32x128xf32>
    %cst_142 = arith.constant 0.000000e+00 : f32
    %358 = vector.broadcast %cst_142 : f32 to vector<32x128xf32>
    %359 = arith.maximumf %357, %358 : vector<32x128xf32>
    %c464 = arith.constant 464 : index
    %c0_143 = arith.constant 0 : index
    %360 = vector.load %arg6[%c464, %c0_143] : memref<504x32xf32, #tpu.memory_space<vmem>>, vector<32x32xf32>
    %cst_144 = arith.constant dense<0.000000e+00> : vector<32x128xf32>
    %361 = tpu.matmul %360, %359, %cst_144 {dimension_numbers = #tpu.dot_dimension_numbers<[1], [0], [0], [1], [0, 0, 1, 1], [], []>} : vector<32x32xf32>, vector<32x128xf32>, vector<32x128xf32> -> vector<32x128xf32>
    %362 = arith.addf %350, %361 : vector<32x128xf32>
    %c464_145 = arith.constant 464 : index
    %c0_146 = arith.constant 0 : index
    %363 = vector.load %arg7[%c464_145, %c0_146] : memref<504x1xf32, #tpu.memory_space<vmem>>, vector<32x1xf32>
    %364 = vector.broadcast %363 : vector<32x1xf32> to vector<32x128xf32>
    %365 = arith.addf %362, %364 : vector<32x128xf32>
    %c496 = arith.constant 496 : index
    %c0_147 = arith.constant 0 : index
    %366 = vector.load %arg6[%c496, %c0_147] : memref<504x32xf32, #tpu.memory_space<vmem>>, vector<8x32xf32>
    %cst_148 = arith.constant dense<0.000000e+00> : vector<8x128xf32>
    %367 = tpu.matmul %366, %365, %cst_148 {dimension_numbers = #tpu.dot_dimension_numbers<[1], [0], [0], [1], [0, 0, 1, 1], [], []>} : vector<8x32xf32>, vector<32x128xf32>, vector<8x128xf32> -> vector<8x128xf32>
    %c496_149 = arith.constant 496 : index
    %c0_150 = arith.constant 0 : index
    %368 = vector.load %arg7[%c496_149, %c0_150] : memref<504x1xf32, #tpu.memory_space<vmem>>, vector<8x1xf32>
    %369 = vector.broadcast %368 : vector<8x1xf32> to vector<8x128xf32>
    %370 = arith.addf %367, %369 : vector<8x128xf32>
    %371 = vector.extract_strided_slice %370 {offsets = [0, 0], sizes = [1, 128], strides = [1, 1]} : vector<8x128xf32> to vector<1x128xf32>
    %c0_151 = arith.constant 0 : index
    %c0_152 = arith.constant 0 : index
    %c0_153 = arith.constant 0 : index
    %372 = vector.load %arg8[%c0_151, %c0_152, %c0_153] : memref<1x1x128xf32, #tpu.memory_space<vmem>>, vector<1x1x128xf32>
    %373 = vector.shape_cast %372 : vector<1x1x128xf32> to vector<1x128xf32>
    %374 = vector.shape_cast %371 : vector<1x128xf32> to vector<1x1x128xf32>
    tpu.vector_store %arg8[%c0_151, %c0_152, %c0_153], %374 {strides = array<i32>} : memref<1x1x128xf32, #tpu.memory_space<vmem>>, vector<1x1x128xf32>,
    return
  }
  func.func @transform_0(%arg0: i32, %arg1: i32) -> (i32, i32, i32) {
    %c0_i32 = arith.constant 0 : i32
    %c0_i32_0 = arith.constant 0 : i32
    return %arg0, %c0_i32, %arg1 : i32, i32, i32
  }
  func.func @transform_1(%arg0: i32, %arg1: i32) -> (i32, i32, i32) {
    %c0_i32 = arith.constant 0 : i32
    %c0_i32_0 = arith.constant 0 : i32
    %c0_i32_1 = arith.constant 0 : i32
    return %arg0, %c0_i32, %c0_i32_0 : i32, i32, i32
  }
  func.func @transform_2(%arg0: i32, %arg1: i32) -> (i32, i32, i32) {
    %c0_i32 = arith.constant 0 : i32
    %c0_i32_0 = arith.constant 0 : i32
    %c0_i32_1 = arith.constant 0 : i32
    return %arg0, %c0_i32, %c0_i32_0 : i32, i32, i32
  }
  func.func @transform_3(%arg0: i32, %arg1: i32) -> (i32, i32, i32) {
    %c0_i32 = arith.constant 0 : i32
    %c0_i32_0 = arith.constant 0 : i32
    %c0_i32_1 = arith.constant 0 : i32
    return %arg0, %c0_i32, %c0_i32_0 : i32, i32, i32
  }
  func.func @transform_4(%arg0: i32, %arg1: i32) -> (i32, i32) {
    %c0_i32 = arith.constant 0 : i32
    %c0_i32_0 = arith.constant 0 : i32
    %c0_i32_1 = arith.constant 0 : i32
    return %c0_i32, %c0_i32_0 : i32, i32
  }
  func.func @transform_5(%arg0: i32, %arg1: i32) -> (i32, i32) {
    %c0_i32 = arith.constant 0 : i32
    %c0_i32_0 = arith.constant 0 : i32
    %c0_i32_1 = arith.constant 0 : i32
    return %c0_i32, %c0_i32_0 : i32, i32
  }
  func.func @transform_6(%arg0: i32, %arg1: i32) -> (i32, i32, i32) {
    %c0_i32 = arith.constant 0 : i32
    %c0_i32_0 = arith.constant 0 : i32
    return %arg0, %c0_i32, %arg1 : i32, i32, i32
  }
}

</mosaic_0001>

<bundles_post_ra>
// kernel: mlp3d_forward.1
= control target key start
LH: loop header
LB: loop body
LE: loop exit
PB: predicated region body
PF: predicated region fallthrough
CT: control target
= control target key end

     0   :  { %11 = vsyncpa [#allocation3], 0  ;;  %s3166_s0 = inlined_call_operand.vmem [shape: f32[2,8,128], index: 0, kind: input, shape index: {}]   ;;  %s3167_s1 = inlined_call_operand.vmem [shape: f32[2,48,64], index: 1, kind: input, shape index: {}]   ;;  %s3168_s2 = inlined_call_operand.vmem [shape: f32[2,48,64], index: 2, kind: input, shape index: {}]   ;;  %s3169_s3 = inlined_call_operand.vmem [shape: f32[2,48,64], index: 3, kind: input, shape index: {}]   ;;  %s3170_s4 = inlined_call_operand.vmem [shape: f32[504,32], index: 4, kind: input, shape index: {}]   ;;  %s3171_s5 = inlined_call_operand.vmem [shape: f32[504,1], index: 5, kind: input, shape index: {}]   ;;  %s3172_s6 = inlined_call_operand.hbm [shape: f32[2,1,128], index: 6, kind: output, shape index: {}]  }
   0x1   :  { %13 = vsyncpa [#allocation3 + $0x1], 0  ;;  %s2246_s21 = smov 0   ;;  %s2248_s22 = smov 0  }
   0x2   :  { %s2250_s23 = smov 0   ;;  %s2252_s24 = smov 0  }
   0x3   :  { %s2254_s25 = smov 0   ;;  %s2256_s26 = smov 0  }
   0x4 LB: > { %s1966_s27 = sadd.s32 4294967295, %s2208_s26   ;;  %s1967_s28 = sadd.s32 4294967294, %s2208_s26   ;;  %s2208_s26 = sphi %s2256_s26, %s19_s26   ;;  %s2204_s25 = sphi %s2254_s25, %s3179_s25   ;;  %s2200_s24 = sphi %s2252_s24, %s3178_s24   ;;  %s2196_s23 = sphi %s2250_s23, %s3177_s23   ;;  %s2192_s22 = sphi %s2248_s22, %s3176_s22   ;;  %s2188_s21 = sphi %s2246_s21, %s3175_s21  }
   0x5   : > { %s31_s29 = sadd.s32 1, %s2204_s25  ;;  %s188_s30 = sadd.s32 1, %s2196_s23 }
   0x6   : > { %p33_p0 = scmp.ge.s32.totalorder %s31_s29, 2  ;;  %p198_p1 = scmp.ne.s32.totalorder %s2196_s23, %s2192_s22 }
   0x7   : > { %p199_p2 = scmp.eq.s32.totalorder %s1966_s27, 1  ;;  %p204_p3 = scmp.ne.s32.totalorder %s2192_s22, %s2188_s21 }
   0x8   : > { %s3181_s29 = smov (%p33_p0, %s31_s29), 0  ;;  %p205_p5 = scmp.eq.s32.totalorder %s1967_s28, 1 }
   0x9   : > { %p2286_p4 = por %p199_p2, %p198_p1  ;;  %s183_s8 = ssub.s32 %s2204_s25, %s3181_s29 }
   0xa   : > { %p1970_p6 = scmp.ge.s32.totalorder %s2208_s26, 1  ;;  %p186_p7 = scmp.eq.s32.totalorder %s183_s8, 0 }
   0xb   : > { %p2293_p8 = por %p205_p5, %p204_p3  ;;  %p263_p9 = scmp.lt.s32.totalorder %s2208_s26, 3 }
   0xc   : > { %s2299_s10 = scalar_select %p186_p7, %s2196_s23, %s188_s30  }
   0xd   : > { %p264_p10 = pnand %p1970_p6, %p263_p9 }
   0xe   : > { %p309_p11 = scmp.lt.s32.totalorder (!%p264_p10), %s2200_s24, 1  ;;  %s307_s18 = sand.u32 (!%p264_p10), 1, %s2192_s22  }
   0xf   : > { %267 = sbr.rel (%p264_p10) target bundleno = 1705 (0x6a9), region = 44  ;;  %s308_s30 = scalar_lea.vmem (!%p264_p10), [#allocation2], %s307_s18 }
  0x10   : > { %s1861_s8 = sshll.u32 (!%p264_p10), %s308_s30, 4  ;;  %s1862_s8 = int_to_ptr.vmem [resolvable:$true] %s1861_s8 }
  0x14   : > { %s2303_s11 = scalar_select %p309_p11, %s2200_s24, 1  ;;  %v332_v4 = vlaneseq }
  0x16   : > { %s1971_s12 = sshll.u32 %s2303_s11, 3  ;;  %v2312_v7 = vshrl.u32 %v332_v4, 7  ;;  %s2565_s16 = smul.u32 48, %s2303_s11 }
  0x17   : > { %s315_s15 = scalar_lea.vmem %s3166_s0, %s1971_s12 }
  0x18   : > { %v2309_v0 = vld [vmem:[%s315_s15] sm:$0xff]  ;;  %v2319_v11 = vadd.s32 56, %v2312_v7  ;;  %v2331_v17 = vadd.s32 48, %v2312_v7  ;;  %v2334_v18 = vadd.s32 40, %v2312_v7  ;;  %v2337_v19 = vadd.s32 32, %v2312_v7  ;;  %s2592_s19 = scalar_lea.vmem %s3168_s2, %s2565_s16  ;;  %s2607_s28 = scalar_lea.vmem %s3167_s1, %s2565_s16 }
  0x19   : > { %v347_v1 = vadd.f32 1.0, %v2309_v0  ;;  %v2342_v22 = vadd.s32 24, %v2312_v7  ;;  %v2349_v26 = vadd.s32 16, %v2312_v7  ;;  %s2751_s11 = scalar_lea.vmem %s3169_s3, %s2565_s16 }
  0x1b   : > { %v348_v2 = vmul.f32 0.5, %v347_v1 }
  0x1d   : > { %v349_v3 = vmul.f32 7.0, %v348_v2 }
  0x1f   : > { %v350_v5 = vmax.f32 %v349_v3, 0.0 }
  0x21   : > { %v351_v6 = vmin.f32 %v350_v5, 7.0 }
  0x23   : > { %v352_v8 = vfloor.f32 %v351_v6 }
  0x25   : > { %v2314_v9 = vsub.f32 %v351_v6, %v352_v8  ;;  %v2316_v10 = vcvt.f32.s32 %v352_v8 }
  0x27   : > { %v355_v12 = vadd.s32 1, %v2316_v10  ;;  %v2323_v13 = vsub.f32 1.0, %v2314_v9  ;;  %v2326_v14 = vmul.u32 8, %v2316_v10  ;;  %v364_v15 = vrot.slane %v2316_v10, 7 }
  0x28   : > { %v414_v16 = vrot.slane %v2314_v9, 1 }
  0x29   : > { %vm356_vm0 = vcmp.lt.s32.totalorder %v355_v12, 7  ;;  %v360_v20 = vrot.slane %v2323_v13, 1  ;;  %v365_v21 = vadd.s32 %v364_v15, %v2326_v14 }
  0x2a   : > { %v2344_v23 = vsel %vm356_vm0, %v355_v12, 7  ;;  %v416_v24 = vmul.f32 %v414_v16, %v2323_v13  ;;  %v445_v25 = vmul.f32 %v414_v16, %v2314_v9 }
  0x2b   : > { %v362_v27 = vmul.f32 %v360_v20, %v2323_v13  ;;  %v384_v28 = vmul.f32 %v360_v20, %v2314_v9  ;;  %v385_v29 = vrot.slane %v2344_v23, 7  ;;  %v2355_v30 = vmul.u32 8, %v2344_v23 }
  0x2c   : > { %v2357_v31 = vperm.slane %v365_v21, 2  ;;  %v2359_v32 = vperm.slane %v416_v24, 1  ;;  %v2361_v33 = vperm.slane %v445_v25, 1  ;;  %v2363_v34 = vperm.slane %v365_v21, 1 }
  0x2d   : > { %v386_v35 = vadd.s32 %v385_v29, %v2326_v14  ;;  %v418_v36 = vadd.s32 %v2355_v30, %v364_v15  ;;  %v446_v37 = vadd.s32 %v2355_v30, %v385_v29  ;;  %v2368_v38 = vperm.slane %v362_v27, 1 }
  0x2e   : > { %vm487_vm1 = vcmp.eq.s32.totalorder %v2319_v11, %v2357_v31  ;;  %v2372_v39 = vperm.slane %v384_v28, 1  ;;  %vm374_vm2 = vcmp.eq.s32.totalorder %v2319_v11, %v2363_v34  ;;  %v2376_v40 = vperm.slane %v362_v27, 0 }
  0x2f   : > { %v496_v41 = vsel %vm487_vm1, %v2368_v38, 0.0  ;;  %v2379_v42 = vperm.slane %v386_v35, 2  ;;  %v2381_v43 = vperm.slane %v418_v36, 2  ;;  %v2383_v44 = vperm.slane %v446_v37, 2 }
  0x30   : > { %v383_v45 = vsel %vm374_vm2, %v2376_v40, 0.0  ;;  %v2386_v46 = vperm.slane %v386_v35, 1  ;;  %v2388_v47 = vperm.slane %v384_v28, 0  ;;  %v2390_v48 = vperm.slane %v418_v36, 1 }
  0x31   : > { %vm505_vm3 = vcmp.eq.s32.totalorder %v2319_v11, %v2379_v42  ;;  %vm531_vm4 = vcmp.eq.s32.totalorder %v2319_v11, %v2381_v43  ;;  %vm557_vm5 = vcmp.eq.s32.totalorder %v2319_v11, %v2383_v44  ;;  %v2398_v49 = vperm.slane %v416_v24, 0 }
  0x32   : > { %v514_v50 = vsel %vm505_vm3, %v2372_v39, 0.0  ;;  %v540_v51 = vsel %vm531_vm4, %v2359_v32, 0.0  ;;  %v566_v52 = vsel %vm557_vm5, %v2361_v33, 0.0  ;;  %vm395_vm6 = vcmp.eq.s32.totalorder %v2319_v11, %v2386_v46 }
  0x33   : > { %v522_v53 = vadd.f32 %v514_v50, %v496_v41  ;;  %v404_v54 = vsel %vm395_vm6, %v2388_v47, 0.0  ;;  %vm427_vm7 = vcmp.eq.s32.totalorder %v2319_v11, %v2390_v48  ;;  %v2408_v55 = vperm.slane %v446_v37, 1 }
  0x34   : > { %v412_v56 = vadd.f32 %v404_v54, %v383_v45  ;;  %v436_v57 = vsel %vm427_vm7, %v2398_v49, 0.0  ;;  %v2411_v58 = vperm.slane %v445_v25, 0  ;;  %vm486_vm8 = vcmp.eq.s32.totalorder %v2331_v17, %v2357_v31 }
  0x35   : > { %v548_v59 = vadd.f32 %v540_v51, %v522_v53  ;;  %vm455_vm9 = vcmp.eq.s32.totalorder %v2319_v11, %v2408_v55  ;;  %v495_v60 = vsel %vm486_vm8, %v2368_v38, 0.0  ;;  %vm504_vm10 = vcmp.eq.s32.totalorder %v2331_v17, %v2379_v42 }
  0x36   : > { %v444_v61 = vadd.f32 %v436_v57, %v412_v56  ;;  %v464_v62 = vsel %vm455_vm9, %v2411_v58, 0.0  ;;  %v513_v63 = vsel %vm504_vm10, %v2372_v39, 0.0  ;;  %vm530_vm11 = vcmp.eq.s32.totalorder %v2331_v17, %v2381_v43 }
  0x37   : > { %v574_v1 = vadd.f32 %v566_v52, %v548_v59  ;;  %v521_v2 = vadd.f32 %v513_v63, %v495_v60  ;;  %v539_v3 = vsel %vm530_vm11, %v2359_v32, 0.0  ;;  %vm556_vm12 = vcmp.eq.s32.totalorder %v2331_v17, %v2383_v44 }
  0x38   : > { %v472_v4 = vadd.f32 %v464_v62, %v444_v61  ;;  %v565_v5 = vsel %vm556_vm12, %v2361_v33, 0.0  ;;  %vm373_vm13 = vcmp.eq.s32.totalorder %v2331_v17, %v2363_v34  ;;  %vm394_vm14 = vcmp.eq.s32.totalorder %v2331_v17, %v2386_v46 }
  0x39   : > { %2058 = vmatpush.msra.mxu2 %v574_v1  ;;  %v547_v6 = vadd.f32 %v539_v3, %v521_v2  ;;  %v382_v8 = vsel %vm373_vm13, %v2376_v40, 0.0  ;;  %v403_v12 = vsel %vm394_vm14, %v2388_v47, 0.0  ;;  %vm426_vm15 = vcmp.eq.s32.totalorder %v2331_v17, %v2390_v48  ;;  %602 = vmatpush.msra.mxu0 %v574_v1 }
  0x3a   : > { %655 = vmatpush.msra.mxu1 %v472_v4  ;;  %v411_v15 = vadd.f32 %v403_v12, %v382_v8  ;;  %v435_v16 = vsel %vm426_vm15, %v2398_v49, 0.0  ;;  %vm454_vm0 = vcmp.eq.s32.totalorder %v2331_v17, %v2408_v55  ;;  %vm485_vm1 = vcmp.eq.s32.totalorder %v2334_v18, %v2357_v31 }
  0x3b   : > { %v573_v20 = vadd.f32 %v565_v5, %v547_v6  ;;  %v463_v21 = vsel %vm454_vm0, %v2411_v58, 0.0  ;;  %v494_v24 = vsel %vm485_vm1, %v2368_v38, 0.0  ;;  %vm503_vm2 = vcmp.eq.s32.totalorder %v2334_v18, %v2379_v42 }
  0x3c   : > { %v443_v25 = vadd.f32 %v435_v16, %v411_v15  ;;  %v512_v27 = vsel %vm503_vm2, %v2372_v39, 0.0  ;;  %vm529_vm3 = vcmp.eq.s32.totalorder %v2334_v18, %v2381_v43  ;;  %vm555_vm4 = vcmp.eq.s32.totalorder %v2334_v18, %v2383_v44 }
  0x3d   : > { %2059 = vmatpush.msra.mxu2 %v573_v20  ;;  %v520_v28 = vadd.f32 %v512_v27, %v494_v24  ;;  %v538_v29 = vsel %vm529_vm3, %v2359_v32, 0.0  ;;  %v564_v35 = vsel %vm555_vm4, %v2361_v33, 0.0  ;;  %vm372_vm5 = vcmp.eq.s32.totalorder %v2334_v18, %v2363_v34  ;;  %603 = vmatpush.msra.mxu0 %v573_v20 }
  0x3e   : > { %v471_v36 = vadd.f32 %v463_v21, %v443_v25  ;;  %v381_v37 = vsel %vm372_vm5, %v2376_v40, 0.0  ;;  %vm393_vm6 = vcmp.eq.s32.totalorder %v2334_v18, %v2386_v46  ;;  %vm425_vm7 = vcmp.eq.s32.totalorder %v2334_v18, %v2390_v48 }
  0x3f   : > { %v546_v41 = vadd.f32 %v538_v29, %v520_v28  ;;  %v402_v45 = vsel %vm393_vm6, %v2388_v47, 0.0  ;;  %v434_v50 = vsel %vm425_vm7, %v2398_v49, 0.0  ;;  %vm453_vm8 = vcmp.eq.s32.totalorder %v2334_v18, %v2408_v55 }
  0x40   : > { %656 = vmatpush.msra.mxu1 %v471_v36  ;;  %v410_v51 = vadd.f32 %v402_v45, %v381_v37  ;;  %v462_v52 = vsel %vm453_vm8, %v2411_v58, 0.0  ;;  %vm484_vm9 = vcmp.eq.s32.totalorder %v2337_v19, %v2357_v31  ;;  %vm502_vm10 = vcmp.eq.s32.totalorder %v2337_v19, %v2379_v42 }
  0x41   : > { %v572_v53 = vadd.f32 %v564_v35, %v546_v41  ;;  %v493_v54 = vsel %vm484_vm9, %v2368_v38, 0.0  ;;  %v511_v56 = vsel %vm502_vm10, %v2372_v39, 0.0  ;;  %vm528_vm11 = vcmp.eq.s32.totalorder %v2337_v19, %v2381_v43 }
  0x42   : > { %v442_v57 = vadd.f32 %v434_v50, %v410_v51  ;;  %v519_v59 = vadd.f32 %v511_v56, %v493_v54  ;;  %v537_v60 = vsel %vm528_vm11, %v2359_v32, 0.0  ;;  %vm554_vm12 = vcmp.eq.s32.totalorder %v2337_v19, %v2383_v44 }
  0x43   : > { %2060 = vmatpush.msra.mxu2 %v572_v53  ;;  %v563_v61 = vsel %vm554_vm12, %v2361_v33, 0.0  ;;  %vm371_vm13 = vcmp.eq.s32.totalorder %v2337_v19, %v2363_v34  ;;  %vm392_vm14 = vcmp.eq.s32.totalorder %v2337_v19, %v2386_v46  ;;  %vm424_vm15 = vcmp.eq.s32.totalorder %v2337_v19, %v2390_v48  ;;  %604 = vmatpush.msra.mxu0 %v572_v53 }
  0x44   : > { %v470_v62 = vadd.f32 %v462_v52, %v442_v57  ;;  %v545_v63 = vadd.f32 %v537_v60, %v519_v59  ;;  %v380_v1 = vsel %vm371_vm13, %v2376_v40, 0.0  ;;  %v401_v2 = vsel %vm392_vm14, %v2388_v47, 0.0 }
  0x45   : > { %v409_v3 = vadd.f32 %v401_v2, %v380_v1  ;;  %v433_v4 = vsel %vm424_vm15, %v2398_v49, 0.0  ;;  %vm452_vm0 = vcmp.eq.s32.totalorder %v2337_v19, %v2408_v55  ;;  %vm483_vm1 = vcmp.eq.s32.totalorder %v2342_v22, %v2357_v31 }
  0x46   : > { %657 = vmatpush.msra.mxu1 %v470_v62  ;;  %v571_v5 = vadd.f32 %v563_v61, %v545_v63  ;;  %v461_v6 = vsel %vm452_vm0, %v2411_v58, 0.0  ;;  %v492_v8 = vsel %vm483_vm1, %v2368_v38, 0.0  ;;  %vm501_vm2 = vcmp.eq.s32.totalorder %v2342_v22, %v2379_v42 }
  0x47   : > { %v441_v12 = vadd.f32 %v433_v4, %v409_v3  ;;  %v510_v15 = vsel %vm501_vm2, %v2372_v39, 0.0  ;;  %vm527_vm3 = vcmp.eq.s32.totalorder %v2342_v22, %v2381_v43  ;;  %vm553_vm4 = vcmp.eq.s32.totalorder %v2342_v22, %v2383_v44 }
  0x48   : > { %2061 = vmatpush.msra.mxu2 %v571_v5  ;;  %v518_v16 = vadd.f32 %v510_v15, %v492_v8  ;;  %v536_v20 = vsel %vm527_vm3, %v2359_v32, 0.0  ;;  %v562_v21 = vsel %vm553_vm4, %v2361_v33, 0.0  ;;  %vm370_vm5 = vcmp.eq.s32.totalorder %v2342_v22, %v2363_v34  ;;  %605 = vmatpush.msra.mxu0 %v571_v5 }
  0x49   : > { %v469_v24 = vadd.f32 %v461_v6, %v441_v12  ;;  %v379_v25 = vsel %vm370_vm5, %v2376_v40, 0.0  ;;  %vm391_vm6 = vcmp.eq.s32.totalorder %v2342_v22, %v2386_v46  ;;  %vm423_vm7 = vcmp.eq.s32.totalorder %v2342_v22, %v2390_v48 }
  0x4a   : > { %v544_v27 = vadd.f32 %v536_v20, %v518_v16  ;;  %v400_v28 = vsel %vm391_vm6, %v2388_v47, 0.0  ;;  %v432_v29 = vsel %vm423_vm7, %v2398_v49, 0.0  ;;  %vm451_vm8 = vcmp.eq.s32.totalorder %v2342_v22, %v2408_v55 }
  0x4b   : > { %658 = vmatpush.msra.mxu1 %v469_v24  ;;  %v408_v35 = vadd.f32 %v400_v28, %v379_v25  ;;  %v460_v36 = vsel %vm451_vm8, %v2411_v58, 0.0  ;;  %vm482_vm9 = vcmp.eq.s32.totalorder %v2349_v26, %v2357_v31  ;;  %vm500_vm10 = vcmp.eq.s32.totalorder %v2349_v26, %v2379_v42 }
  0x4c   : > { %v570_v37 = vadd.f32 %v562_v21, %v544_v27  ;;  %v491_v41 = vsel %vm482_vm9, %v2368_v38, 0.0  ;;  %v509_v45 = vsel %vm500_vm10, %v2372_v39, 0.0  ;;  %vm526_vm11 = vcmp.eq.s32.totalorder %v2349_v26, %v2381_v43 }
  0x4d   : > { %v440_v50 = vadd.f32 %v432_v29, %v408_v35  ;;  %v517_v51 = vadd.f32 %v509_v45, %v491_v41  ;;  %v535_v52 = vsel %vm526_vm11, %v2359_v32, 0.0  ;;  %vm552_vm12 = vcmp.eq.s32.totalorder %v2349_v26, %v2383_v44 }
  0x4e   : > { %2062 = vmatpush.msra.mxu2 %v570_v37  ;;  %v561_v53 = vsel %vm552_vm12, %v2361_v33, 0.0  ;;  %vm369_vm13 = vcmp.eq.s32.totalorder %v2349_v26, %v2363_v34  ;;  %vm390_vm14 = vcmp.eq.s32.totalorder %v2349_v26, %v2386_v46  ;;  %vm422_vm15 = vcmp.eq.s32.totalorder %v2349_v26, %v2390_v48  ;;  %606 = vmatpush.msra.mxu0 %v570_v37 }
  0x4f   : > { %v468_v54 = vadd.f32 %v460_v36, %v440_v50  ;;  %v543_v56 = vadd.f32 %v535_v52, %v517_v51  ;;  %v378_v57 = vsel %vm369_vm13, %v2376_v40, 0.0  ;;  %v399_v59 = vsel %vm390_vm14, %v2388_v47, 0.0  ;;  %v341_v50 = vld [vmem:[%s2607_s28] sm:$0xff] }
  0x50   : > { %v407_v60 = vadd.f32 %v399_v59, %v378_v57  ;;  %v431_v61 = vsel %vm422_vm15, %v2398_v49, 0.0  ;;  %vm450_vm0 = vcmp.eq.s32.totalorder %v2349_v26, %v2408_v55  ;;  %v2536_v62 = vadd.s32 8, %v2312_v7 }
  0x51   : > { %659 = vmatpush.msra.mxu1 %v468_v54  ;;  %v569_v63 = vadd.f32 %v561_v53, %v543_v56  ;;  %v459_v1 = vsel %vm450_vm0, %v2411_v58, 0.0  ;;  %vm480_vm1 = vcmp.eq.s32.totalorder %v2312_v7, %v2357_v31  ;;  %vm498_vm2 = vcmp.eq.s32.totalorder %v2312_v7, %v2379_v42  ;;  %v473_v53 = vld [vmem:[%s2592_s19] sm:$0xff] }
  0x52   : > { %v439_v2 = vadd.f32 %v431_v61, %v407_v60  ;;  %vm481_vm3 = vcmp.eq.s32.totalorder %v2536_v62, %v2357_v31  ;;  %vm499_vm4 = vcmp.eq.s32.totalorder %v2536_v62, %v2379_v42  ;;  %vm525_vm5 = vcmp.eq.s32.totalorder %v2536_v62, %v2381_v43 }
  0x53   : > { %2063 = vmatpush.msra.mxu2 %v569_v63  ;;  %v490_v3 = vsel %vm481_vm3, %v2368_v38, 0.0  ;;  %v508_v4 = vsel %vm499_vm4, %v2372_v39, 0.0  ;;  %v534_v5 = vsel %vm525_vm5, %v2359_v32, 0.0  ;;  %vm551_vm6 = vcmp.eq.s32.totalorder %v2536_v62, %v2383_v44  ;;  %607 = vmatpush.msra.mxu0 %v569_v63 }
  0x54   : > { %v467_v6 = vadd.f32 %v459_v1, %v439_v2  ;;  %v516_v8 = vadd.f32 %v508_v4, %v490_v3  ;;  %v560_v12 = vsel %vm551_vm6, %v2361_v33, 0.0  ;;  %vm368_vm7 = vcmp.eq.s32.totalorder %v2536_v62, %v2363_v34  ;;  %v478_v3 = vld [vmem:[%s2592_s19 + $0x28] sm:$0xff] }
  0x55   : > { %v377_v15 = vsel %vm368_vm7, %v2376_v40, 0.0  ;;  %vm389_vm8 = vcmp.eq.s32.totalorder %v2536_v62, %v2386_v46  ;;  %vm421_vm9 = vcmp.eq.s32.totalorder %v2536_v62, %v2390_v48  ;;  %vm449_vm10 = vcmp.eq.s32.totalorder %v2536_v62, %v2408_v55 }
  0x56   : > { %660 = vmatpush.msra.mxu1 %v467_v6  ;;  %v542_v16 = vadd.f32 %v534_v5, %v516_v8  ;;  %v398_v20 = vsel %vm389_vm8, %v2388_v47, 0.0  ;;  %v430_v21 = vsel %vm421_vm9, %v2398_v49, 0.0  ;;  %v458_v24 = vsel %vm449_vm10, %v2411_v58, 0.0 }
  0x57   : > { %v406_v25 = vadd.f32 %v398_v20, %v377_v15  ;;  %v489_v27 = vsel %vm480_vm1, %v2368_v38, 0.0  ;;  %v507_v28 = vsel %vm498_vm2, %v2372_v39, 0.0  ;;  %vm524_vm11 = vcmp.eq.s32.totalorder %v2312_v7, %v2381_v43 }
  0x58   : > { %v568_v29 = vadd.f32 %v560_v12, %v542_v16  ;;  %v515_v35 = vadd.f32 %v507_v28, %v489_v27  ;;  %v533_v36 = vsel %vm524_vm11, %v2359_v32, 0.0  ;;  %vm550_vm12 = vcmp.eq.s32.totalorder %v2312_v7, %v2383_v44  ;;  %v477_v44 = vld [vmem:[%s2592_s19 + $0x20] sm:$0xff] }
  0x59   : > { %v438_v37 = vadd.f32 %v430_v21, %v406_v25  ;;  %v559_v41 = vsel %vm550_vm12, %v2361_v33, 0.0  ;;  %vm367_vm13 = vcmp.eq.s32.totalorder %v2312_v7, %v2363_v34  ;;  %vm388_vm14 = vcmp.eq.s32.totalorder %v2312_v7, %v2386_v46  ;;  %v474_v21 = vld [vmem:[%s2592_s19 + $0x8] sm:$0xff] }
  0x5a   : > { %2064 = vmatpush.msra.mxu2 %v568_v29  ;;  %v541_v31 = vadd.f32 %v533_v36, %v515_v35  ;;  %v376_v32 = vsel %vm367_vm13, %v2376_v40, 0.0  ;;  %v397_v38 = vsel %vm388_vm14, %v2388_v47, 0.0  ;;  %vm420_vm15 = vcmp.eq.s32.totalorder %v2312_v7, %v2390_v48  ;;  %608 = vmatpush.msra.mxu0 %v568_v29 }
  0x5b   : > { %v466_v33 = vadd.f32 %v458_v24, %v438_v37  ;;  %v405_v34 = vadd.f32 %v397_v38, %v376_v32  ;;  %v429_v39 = vsel %vm420_vm15, %v2398_v49, 0.0  ;;  %vm448_vm0 = vcmp.eq.s32.totalorder %v2312_v7, %v2408_v55 }
  0x5c   : > { %v567_v42 = vadd.f32 %v559_v41, %v541_v31  ;;  %v457_v43 = vsel %vm448_vm0, %v2411_v58, 0.0  ;;  %vm575_vm1 = vcmask 523264   ;;  %v688_v40 = vrot.slane %v2323_v13, 2 }
  0x5d   : > { %661 = vmatpush.msra.mxu1 %v466_v33  ;;  %v437_v46 = vadd.f32 %v429_v39, %v405_v34  ;;  %v691_v47 = vrot.slane %v2316_v10, 6  ;;  %v712_v48 = vrot.slane %v2344_v23, 6  ;;  %v740_v49 = vrot.slane %v2314_v9, 2 }
  0x5e   : > { %2065 = vmatpush.msra.mxu2 %v567_v42  ;;  %v690_v55 = vmul.f32 %v688_v40, %v2323_v13  ;;  %v711_v58 = vmul.f32 %v688_v40, %v2314_v9  ;;  %609 = vmatpush.msra.mxu0 %v567_v42 }
  0x5f   : > { %v465_v45 = vadd.f32 %v457_v43, %v437_v46  ;;  %1979 = vmatmul.msk.f32.vlgmr.msra.gmra.mxu2 %vm575_vm1, %v477_v44  ;;  %v692_v51 = vadd.s32 %v691_v47, %v2326_v14  ;;  %v713_v52 = vadd.s32 %v712_v48, %v2326_v14  ;;  %v742_v10 = vmul.f32 %v740_v49, %v2323_v13  ;;  %v343_v44 = vld [vmem:[%s2607_s28 + $0x10] sm:$0xff] }
  0x60   : > { %v2621_v23 = vperm.slane %v690_v55, 0  ;;  %v2623_v54 = vperm.slane %v711_v58, 0  ;;  %v743_v56 = vadd.s32 %v691_v47, %v2355_v30  ;;  %v770_v57 = vmul.f32 %v740_v49, %v2314_v9  ;;  %1975 = vmatmul.msk.f32.vlgmr.msra.gmra.mxu0 %vm575_vm1, %v473_v53 }
  0x61   : > { %662 = vmatpush.msra.mxu1 %v465_v45  ;;  %v2628_v59 = vperm.slane %v692_v51, 2  ;;  %v2630_v60 = vperm.slane %v713_v52, 2  ;;  %v2632_v14 = vperm.slane %v742_v10, 0  ;;  %v771_v13 = vadd.s32 %v712_v48, %v2355_v30 }
  0x62   : > { %1981 = vmatmul.msk.f32.vlgmr.msra.gmra.mxu1 %vm575_vm1, %v341_v50  ;;  %v2636_v61 = vperm.slane %v743_v56, 2  ;;  %v2638_v63 = vperm.slane %v770_v57, 0 }
  0x63   : > { %vm701_vm2 = vcmp.eq.s32.totalorder %v2319_v11, %v2628_v59  ;;  %vm722_vm3 = vcmp.eq.s32.totalorder %v2319_v11, %v2630_v60  ;;  %v2644_v9 = vperm.slane %v771_v13, 2  ;;  %vm700_vm4 = vcmp.eq.s32.totalorder %v2331_v17, %v2628_v59 }
  0x64   : > { %v710_v1 = vsel %vm701_vm2, %v2621_v23, 0.0  ;;  %v731_v30 = vsel %vm722_vm3, %v2623_v54, 0.0  ;;  %vm752_vm5 = vcmp.eq.s32.totalorder %v2319_v11, %v2636_v61  ;;  %v709_v2 = vsel %vm700_vm4, %v2621_v23, 0.0 }
  0x65   : > { %v739_v4 = vadd.f32 %v731_v30, %v710_v1  ;;  %v761_v5 = vsel %vm752_vm5, %v2632_v14, 0.0  ;;  %vm780_vm6 = vcmp.eq.s32.totalorder %v2319_v11, %v2644_v9  ;;  %vm721_vm7 = vcmp.eq.s32.totalorder %v2331_v17, %v2630_v60  ;;  %v342_v11 = vld [vmem:[%s2607_s28 + $0x8] sm:$0xff]  ;;  %v344_v30 = vld [vmem:[%s2607_s28 + $0x18] sm:$0xff] }
  0x66   : > { %v789_v6 = vsel %vm780_vm6, %v2638_v63, 0.0  ;;  %v730_v8 = vsel %vm721_vm7, %v2623_v54, 0.0  ;;  %vm751_vm8 = vcmp.eq.s32.totalorder %v2331_v17, %v2636_v61  ;;  %vm779_vm9 = vcmp.eq.s32.totalorder %v2331_v17, %v2644_v9 }
  0x67   : > { %v769_v12 = vadd.f32 %v761_v5, %v739_v4  ;;  %v738_v15 = vadd.f32 %v730_v8, %v709_v2  ;;  %v760_v16 = vsel %vm751_vm8, %v2632_v14, 0.0  ;;  %v788_v20 = vsel %vm779_vm9, %v2638_v63, 0.0  ;;  %1980 = vmatmul.msk.f32.gmra.mxu2 %vm575_vm1, %v478_v3  ;;  %v684_v4 = vld [vmem:[%s2751_s11 + $0x10] sm:$0xff]  ;;  %v861_v5 = vld [vmem:[%s3171_s5 + $0x20] sm:$0xff]  ;;  %v1173_v8 = vld [vmem:[%s3171_s5 + $0x88] sm:$0xff] }
  0x68   : > { %vm699_vm10 = vcmp.eq.s32.totalorder %v2334_v18, %v2628_v59  ;;  %vm720_vm11 = vcmp.eq.s32.totalorder %v2334_v18, %v2630_v60  ;;  %vm750_vm12 = vcmp.eq.s32.totalorder %v2334_v18, %v2636_v61  ;;  %vm778_vm13 = vcmp.eq.s32.totalorder %v2334_v18, %v2644_v9  ;;  %1976 = vmatmul.msk.f32.gmra.mxu0 %vm575_vm1, %v474_v21  ;;  %v1467_v21 = vld [vmem:[%s3171_s5 + $0x120] sm:$0xff] }
  0x69   : > { %v797_v17 = vadd.f32 %v789_v6, %v769_v12  ;;  %v768_v24 = vadd.f32 %v760_v16, %v738_v15  ;;  %v708_v25 = vsel %vm699_vm10, %v2621_v23, 0.0  ;;  %v729_v27 = vsel %vm720_vm11, %v2623_v54, 0.0  ;;  %v685_v6 = vld [vmem:[%s2751_s11 + $0x18] sm:$0xff]  ;;  %v686_v12 = vld [vmem:[%s2751_s11 + $0x20] sm:$0xff]  ;;  %v1170_v15 = vld [vmem:[%s3171_s5 + $0x70] sm:$0xff] }
  0x6a   : > { %v737_v28 = vadd.f32 %v729_v27, %v708_v25  ;;  %v759_v29 = vsel %vm750_vm12, %v2632_v14, 0.0  ;;  %v787_v35 = vsel %vm778_vm13, %v2638_v63, 0.0  ;;  %vm698_vm14 = vcmp.eq.s32.totalorder %v2337_v19, %v2628_v59  ;;  %1982 = vmatmul.msk.f32.gmra.mxu1 %vm575_vm1, %v342_v11  ;;  %v687_v16 = vld [vmem:[%s2751_s11 + $0x28] sm:$0xff]  ;;  %v475_v11 = vld [vmem:[%s2592_s19 + $0x10] sm:$0xff] }
  0x6b   : > { %824 = vmatpush.msrb.mxu2 %v797_v17  ;;  %v796_v18 = vadd.f32 %v788_v20, %v768_v24  ;;  %v707_v36 = vsel %vm698_vm14, %v2621_v23, 0.0  ;;  %vm719_vm15 = vcmp.eq.s32.totalorder %v2337_v19, %v2630_v60  ;;  %vm749_vm0 = vcmp.eq.s32.totalorder %v2337_v19, %v2636_v61  ;;  %v1342_v20 = vld [vmem:[%s3171_s5 + $0xb8] sm:$0xff]  ;;  %v1639_v24 = vld [vmem:[%s3171_s5 + $0x168] sm:$0xff]  ;;  %v1636_v27 = vld [vmem:[%s3171_s5 + $0x150] sm:$0xff] }
  0x6c   : > { %v767_v37 = vadd.f32 %v759_v29, %v737_v28  ;;  %v728_v41 = vsel %vm719_vm15, %v2623_v54, 0.0  ;;  %v758_v31 = vsel %vm749_vm0, %v2632_v14, 0.0  ;;  %vm777_vm2 = vcmp.eq.s32.totalorder %v2337_v19, %v2644_v9  ;;  %v476_v17 = vld [vmem:[%s2592_s19 + $0x18] sm:$0xff] }
  0x6d   : > { %825 = vmatpush.msrb.mxu2 %v796_v18  ;;  %v736_v32 = vadd.f32 %v728_v41, %v707_v36  ;;  %v786_v38 = vsel %vm777_vm2, %v2638_v63, 0.0  ;;  %vm697_vm3 = vcmp.eq.s32.totalorder %v2342_v22, %v2628_v59  ;;  %vm718_vm4 = vcmp.eq.s32.totalorder %v2342_v22, %v2630_v60  ;;  %v1673_v29 = vld [vmem:[%s3171_s5 + $0x1b8] sm:$0xff]  ;;  %v1792_v36 = vld [vmem:[%s3171_s5 + $0x1e0] sm:$0xff] }
  0x6e   : > { %v795_v33 = vadd.f32 %v787_v35, %v767_v37  ;;  %v706_v34 = vsel %vm697_vm3, %v2621_v23, 0.0  ;;  %v727_v39 = vsel %vm718_vm4, %v2623_v54, 0.0  ;;  %vm748_vm5 = vcmp.eq.s32.totalorder %v2342_v22, %v2636_v61 }
  0x6f   : > { %v766_v42 = vadd.f32 %v758_v31, %v736_v32  ;;  %v735_v19 = vadd.f32 %v727_v39, %v706_v34  ;;  %v757_v43 = vsel %vm748_vm5, %v2632_v14, 0.0  ;;  %vm776_vm6 = vcmp.eq.s32.totalorder %v2342_v22, %v2644_v9  ;;  %v1819_v32 = vld [vmem:[%s3171_s5 + $0x1f0] sm:$0xff] }
  0x70   : > { %826 = vmatpush.msrb.mxu2 %v795_v33  ;;  %v785_v40 = vsel %vm776_vm6, %v2638_v63, 0.0  ;;  %vm696_vm7 = vcmp.eq.s32.totalorder %v2349_v26, %v2628_v59  ;;  %vm717_vm8 = vcmp.eq.s32.totalorder %v2349_v26, %v2630_v60  ;;  %vm747_vm9 = vcmp.eq.s32.totalorder %v2349_v26, %v2636_v61  ;;  %1977 = vmatmul.msk.f32.gmra.mxu0 %vm575_vm1, %v475_v11 }
  0x71   : > { %v794_v46 = vadd.f32 %v786_v38, %v766_v42  ;;  %v765_v47 = vadd.f32 %v757_v43, %v735_v19  ;;  %v705_v48 = vsel %vm696_vm7, %v2621_v23, 0.0  ;;  %v726_v49 = vsel %vm717_vm8, %v2623_v54, 0.0 }
  0x72   : > { %v734_v22 = vadd.f32 %v726_v49, %v705_v48  ;;  %v756_v55 = vsel %vm747_vm9, %v2632_v14, 0.0  ;;  %vm775_vm10 = vcmp.eq.s32.totalorder %v2349_v26, %v2644_v9  ;;  %vm695_vm11 = vcmp.eq.s32.totalorder %v2536_v62, %v2628_v59  ;;  %1983 = vmatmul.msk.f32.gmra.mxu1 %vm575_vm1, %v343_v44  ;;  %v857_v48 = vld [vmem:[%s3170_s4 + $0x20] sm:$0xff]  ;;  %v858_v49 = vld [vmem:[%s3170_s4 + $0x28] sm:$0xff] }
  0x73   : > { %827 = vmatpush.msrb.mxu2 %v794_v46  ;;  %v793_v58 = vadd.f32 %v785_v40, %v765_v47  ;;  %v784_v45 = vsel %vm775_vm10, %v2638_v63, 0.0  ;;  %v704_v50 = vsel %vm695_vm11, %v2621_v23, 0.0  ;;  %vm716_vm12 = vcmp.eq.s32.totalorder %v2536_v62, %v2630_v60 }
  0x74   : > { %v764_v51 = vadd.f32 %v756_v55, %v734_v22  ;;  %v725_v52 = vsel %vm716_vm12, %v2623_v54, 0.0  ;;  %vm746_vm13 = vcmp.eq.s32.totalorder %v2536_v62, %v2636_v61  ;;  %vm774_vm14 = vcmp.eq.s32.totalorder %v2536_v62, %v2644_v9  ;;  %v909_v22 = vld [vmem:[%s3170_s4 + $0x50] sm:$0xff]  ;;  %v910_v55 = vld [vmem:[%s3170_s4 + $0x58] sm:$0xff] }
  0x75   : > { %828 = vmatpush.msrb.mxu2 %v793_v58  ;;  %v733_v26 = vadd.f32 %v725_v52, %v704_v50  ;;  %v755_v10 = vsel %vm746_vm13, %v2632_v14, 0.0  ;;  %v783_v53 = vsel %vm774_vm14, %v2638_v63, 0.0  ;;  %vm694_vm15 = vcmp.eq.s32.totalorder %v2312_v7, %v2628_v59  ;;  %v911_v58 = vld [vmem:[%s3170_s4 + $0x60] sm:$0xff] }
  0x76   : > { %v792_v56 = vadd.f32 %v784_v45, %v764_v51  ;;  %v703_v57 = vsel %vm694_vm15, %v2621_v23, 0.0  ;;  %vm715_vm0 = vcmp.eq.s32.totalorder %v2312_v7, %v2630_v60  ;;  %vm745_vm2 = vcmp.eq.s32.totalorder %v2312_v7, %v2636_v61  ;;  %v683_v61 = vld [vmem:[%s2751_s11 + $0x8] sm:$0xff]  ;;  %v905_v50 = vld [vmem:[%s3170_s4] sm:$0xff] }
  0x77   : > { %v763_v62 = vadd.f32 %v755_v10, %v733_v26  ;;  %v724_v13 = vsel %vm715_vm0, %v2623_v54, 0.0  ;;  %v754_v1 = vsel %vm745_vm2, %v2632_v14, 0.0  ;;  %vm773_vm3 = vcmp.eq.s32.totalorder %v2312_v7, %v2644_v9  ;;  %v682_v7 = vld [vmem:[%s2751_s11] sm:$0xff]  ;;  %v862_v9 = vld [vmem:[%s3171_s5 + $0x28] sm:$0xff]  ;;  %s1850_s11 = scalar_lea.sflag [#allocation3], %s307_s18 }
  0x78   : > { %829 = vmatpush.msrb.mxu2 %v792_v56  ;;  %v732_v59 = vadd.f32 %v724_v13, %v703_v57  ;;  %v782_v2 = vsel %vm773_vm3, %v2638_v63, 0.0  ;;  %v345_v14 = vld [vmem:[%s2607_s28 + $0x20] sm:$0xff]  ;;  %v346_v63 = vld [vmem:[%s2607_s28 + $0x28] sm:$0xff]  ;;  %v2210_v3 = vmov 0   ;;  %1978 = vmatmul.msk.f32.gmra.mxu0 %vm575_vm1, %v476_v17  ;;  %vm954_vm4 = vcmask 64512   ;;  %s1859_s28 = scalar_lea.hbm %s3172_s6, %s2200_s24  ;;  %s2150_s24 = scalar_lea.hbm %s3172_s6, 2 }
  0x79   : > { %v791_v23 = vadd.f32 %v783_v53, %v763_v62  ;;  %2127 = vset.pattern.permute.xlu0 %v2210_v3  ;;  %2128 = vset.pattern.permute.xlu1 %v2210_v3  ;;  %v1048_v45 = vld [vmem:[%s3171_s5 + $0x48] sm:$0xff]  ;;  %v1047_v26 = vld [vmem:[%s3171_s5 + $0x40] sm:$0xff]  ;;  %vm1128_vm5 = vcmask 261120   ;;  %s1863_s12 = sshll.u32 %s1859_s28, 4  ;;  %s1864_s12 = int_to_ptr.hbm [resolvable:$true] %s1863_s12 }
  0x7a   : > { %v762_v54 = vadd.f32 %v754_v1, %v732_v59  ;;  %1984 = vmatmul.msk.f32.gmra.mxu1 %vm575_vm1, %v344_v30  ;;  %870 = vperm.xlu0 %2127, %v862_v9   ;;  %v906_v10 = vld [vmem:[%s3170_s4 + $0x8] sm:$0xff]  ;;  %v907_v30 = vld [vmem:[%s3170_s4 + $0x10] sm:$0xff]  ;;  %v1172_v59 = vld [vmem:[%s3171_s5 + $0x80] sm:$0xff]  ;;  %s2144_s13 = sshra.s32 %s1864_s12, 4  ;;  %s2145_s13 = int_to_ptr.hbm [resolvable:$true] %s2144_s13 }
  0x7b   : > { %830 = vmatpush.msrb.mxu2 %v791_v23  ;;  %2129 = vset.pattern.permute.xlu2 %v2210_v3  ;;  %v1171_v9 = vld [vmem:[%s3171_s5 + $0x78] sm:$0xff]  ;;  %v1638_v3 = vld [vmem:[%s3171_s5 + $0x160] sm:$0xff]  ;;  %s2146_s14 = scalar_lea.hbm %s2145_s13, 1  ;;  %p2151_p1 = scmp.lt.s32.totalorder %s2145_s13, %s3172_s6 }
  0x7c   : > { %v790_v60 = vadd.f32 %v782_v2, %v762_v54  ;;  %1066 = vperm.xlu1 %2128, %v1048_v45   ;;  %v908_v54 = vld [vmem:[%s3170_s4 + $0x18] sm:$0xff]  ;;  %p2147_p12 = scmp.ne.s32.totalorder %s2145_s13, %s2146_s14  ;;  %p2152_p2 = scmp.lt.s32.totalorder %s2150_s24, %s2146_s14 }
  0x7e   : > { %831 = vmatpush.msrb.mxu2 %v790_v60  ;;  %v1344_v60 = vld [vmem:[%s3171_s5 + $0xc8] sm:$0xff]  ;;  %p2148_p13 = pnand %p2147_p12, %p2286_p4  ;;  %p2153_p3 = por %p2152_p2, %p2151_p1 }
  0x7f   : > { %1987 = vmatmul.msk.f32.vlgmr.msrb.gmra.mxu2 %vm575_vm1, %v682_v7  ;;  %v1046_v7 = vld [vmem:[%s3171_s5 + $0x38] sm:$0xff] }
  0x80   : > { %1056 = vperm.xlu2 %2129, %v1046_v7   ;;  %p2149_p0 = pneg %p2148_p13 }
  0x82   : > { %1985 = vmatmul.msk.f32.gmra.mxu1 %vm575_vm1, %v345_v14  ;;  %865 = vperm.xlu0 %2127, %v861_v5   ;;  %v1341_v14 = vld [vmem:[%s3171_s5 + $0xb0] sm:$0xff]  ;;  %p2154_p5 = pnand %p2153_p3, %p2149_p0 }
  0x84   : > { %1061 = vperm.xlu1 %2128, %v1047_v26  }
  0x87   : > { %1988 = vmatmul.msk.f32.gmra.mxu2 %vm575_vm1, %v683_v61  ;;  %v1045_v61 = vld [vmem:[%s3171_s5 + $0x30] sm:$0xff] }
  0x88   : > { %1051 = vperm.xlu2 %2129, %v1045_v61  }
  0x8a   : > { %1986 = vmatmul.msk.f32.gmra.mxu1 %vm575_vm1, %v346_v63  ;;  %1191 = vperm.xlu0 %2127, %v1173_v8   ;;  %v1466_v63 = vld [vmem:[%s3171_s5 + $0x118] sm:$0xff]  ;;  %v1675_v8 = vld [vmem:[%s3171_s5 + $0x1c8] sm:$0xff] }
  0x8c   : > { %1186 = vperm.xlu1 %2128, %v1172_v59  }
  0x8f   : > { %1989 = vmatmul.msk.f32.gmra.mxu2 %vm575_vm1, %v684_v4  ;;  %v1343_v4 = vld [vmem:[%s3171_s5 + $0xc0] sm:$0xff] }
  0x90   : > { %1181 = vperm.xlu2 %2129, %v1171_v9  }
  0x92   : > { %1176 = vperm.xlu0 %2127, %v1170_v15  }
  0x94   : > { %1362 = vperm.xlu1 %2128, %v1344_v60  }
  0x97   : > { %1990 = vmatmul.msk.f32.gmra.mxu2 %vm575_vm1, %v685_v6 }
  0x98   : > { %1357 = vperm.xlu2 %2129, %v1343_v4  }
  0x9a   : > { %1352 = vperm.xlu0 %2127, %v1342_v20  }
  0x9c   : > { %1347 = vperm.xlu1 %2128, %v1341_v14  }
  0x9f   : > { %1991 = vmatmul.msk.f32.gmra.mxu2 %vm575_vm1, %v686_v12  ;;  %v1468_v12 = vld [vmem:[%s3171_s5 + $0x128] sm:$0xff] }
  0xa0   : > { %1486 = vperm.xlu2 %2129, %v1468_v12   ;;  %v1075_v12 = vld [vmem:[%s3170_s4 + $0x80] sm:$0xff] }
  0xa2   : > { %1481 = vperm.xlu0 %2127, %v1467_v21  }
  0xa4   : > { %1476 = vperm.xlu1 %2128, %v1466_v63   ;;  %v1084_v63 = vld [vmem:[%s3170_s4 + $0xa8] sm:$0xff] }
  0xa7   : > { %1992 = vmatmul.msk.f32.gmra.mxu2 %vm575_vm1, %v687_v16  ;;  %vm873_vm1 = vcmask 130048   ;;  %v1672_v16 = vld [vmem:[%s3171_s5 + $0x1b0] sm:$0xff] }
  0xaa   : > { %1657 = vperm.xlu0 %2127, %v1639_v24   ;;  %v1465_v24 = vld [vmem:[%s3171_s5 + $0x110] sm:$0xff] }
  0xab   : > { %1471 = vperm.xlu2 %2129, %v1465_v24   ;;  %v1207_v24 = vld [vmem:[%s3170_s4 + $0xf8] sm:$0xff] }
  0xac   : > { %1652 = vperm.xlu1 %2128, %v1638_v3  }
  0xb2   : > { %1642 = vperm.xlu0 %2127, %v1636_v27  }
  0xb4   : > { %1693 = vperm.xlu1 %2128, %v1675_v8  }
  0xba   : > { %1683 = vperm.xlu0 %2127, %v1673_v29   ;;  %v1791_v29 = vld [vmem:[%s3171_s5 + $0x1d8] sm:$0xff] }
  0xbc   : > { %1678 = vperm.xlu1 %2128, %v1672_v16  }
  0xc2   : > { %1806 = vperm.xlu0 %2127, %v1792_v36   ;;  %v1674_v36 = vld [vmem:[%s3171_s5 + $0x1c0] sm:$0xff] }
  0xc4   : > { %1801 = vperm.xlu1 %2128, %v1791_v29  }
  0xca   : > { %1822 = vperm.xlu0 %2127, %v1819_v32   ;;  %v999_v32 = vld [vmem:[%s3170_s4 + $0x48] sm:$0xff] }
  0xdd   : > { %v611_v31 = vpop.f32.mrf.mxu0 }
  0xdf   : > { %v664_v25 = vpop.f32.mrf.mxu1 }
  0xe0   : > { %v665_v42 = vadd.f32 %v664_v25, %v611_v31  ;;  %v1793_v31 = vld [vmem:[%s3171_s5 + $0x1e8] sm:$0xff] }
  0xe2   : > { %v623_v35 = vpop.f32.mrf.mxu2 }
  0xe5   : > { %v614_v39 = vpop.f32.mrf.mxu0 }
  0xe7   : > { %v667_v28 = vpop.f32.mrf.mxu1 }
  0xe8   : > { %v668_v19 = vadd.f32 %v667_v28, %v614_v39  ;;  %v996_v28 = vld [vmem:[%s3170_s4 + $0x30] sm:$0xff] }
  0xea   : > { %v2804_v41 = vpop.f32.mrf.mxu2 }
  0xec   : > { %v871_v6 = vpop.permute.xlu0 %870 }
  0xed   : > { %v617_v52 = vpop.f32.mrf.mxu0 }
  0xef   : > { %v670_v18 = vpop.f32.mrf.mxu1 }
  0xf0   : > { %v671_v53 = vadd.f32 %v670_v18, %v617_v52  ;;  %v997_v18 = vld [vmem:[%s3170_s4 + $0x38] sm:$0xff] }
  0xf4   : > { %v866_v20 = vpop.permute.xlu0 %865 }
  0xf5   : > { %v620_v56 = vpop.f32.mrf.mxu0 }
  0xf7   : > { %v673_v37 = vpop.f32.mrf.mxu1 }
  0xf8   : > { %v674_v62 = vadd.f32 %v673_v37, %v620_v56  ;;  %v998_v37 = vld [vmem:[%s3170_s4 + $0x40] sm:$0xff] }
  0xff   : > { %v676_v38 = vpop.f32.mrf.mxu1 }
 0x100   : > { %v2809_v33 = vadd.f32 %v676_v38, %v623_v35  ;;  %v1637_v35 = vld [vmem:[%s3171_s5 + $0x158] sm:$0xff]  ;;  %v1790_v38 = vld [vmem:[%s3171_s5 + $0x1d0] sm:$0xff] }
 0x101   : > { %1647 = vperm.xlu2 %2129, %v1637_v35  }
 0x102   : > { %v833_v34 = vpop.f32.mrf.mxu2 }
 0x103   : > { %v851_v44 = vadd.f32 %v833_v34, %v665_v42 }
 0x105   : > { %v859_v47 = vmax.f32 %v851_v44, 0.0 }
 0x107   : > { %v2885_v5 = vpop.f32.mrf.mxu1 }
 0x108   : > { %v680_v7 = vadd.f32 %v2885_v5, %v2804_v41  ;;  %v1073_v41 = vld [vmem:[%s3170_s4 + $0x70] sm:$0xff] }
 0x109   : > { %1688 = vperm.xlu2 %2129, %v1674_v36   ;;  %v1209_v36 = vld [vmem:[%s3170_s4 + $0x108] sm:$0xff] }
 0x10a   : > { %v836_v43 = vpop.f32.mrf.mxu2 }
 0x10b   : > { %v852_v40 = vadd.f32 %v836_v43, %v668_v19 }
 0x10d   : > { %v860_v46 = vmax.f32 %v852_v40, 0.0 }
 0x10f   : > { %894 = vmatpush.msrb.mxu1 %v860_v46  ;;  %2066 = vmatpush.msra.mxu3 %v860_v46 }
 0x111   : > { %895 = vmatpush.msrb.mxu1 %v859_v47  ;;  %2067 = vmatpush.msra.mxu3 %v859_v47  ;;  %v1081_v47 = vld [vmem:[%s3170_s4 + $0x90] sm:$0xff] }
 0x112   : > { %1993 = vmatmul.msk.f32.vlgmr.msrb.gmra.mxu1 %vm873_vm1, %v857_v48  ;;  %1994 = vmatmul.msk.f32.vlgmr.msra.gmra.mxu3 %vm873_vm1, %v858_v49  ;;  %v839_v51 = vpop.f32.mrf.mxu2  ;;  %v1082_v49 = vld [vmem:[%s3170_s4 + $0x98] sm:$0xff] }
 0x113   : > { %939 = vmatpush.msrb.mxu3 %v852_v40  ;;  %v853_v57 = vadd.f32 %v839_v51, %v671_v53  ;;  %1811 = vperm.xlu2 %2129, %v1793_v31  }
 0x115   : > { %940 = vmatpush.msrb.mxu3 %v851_v44  ;;  %v1085_v2 = vmax.f32 %v853_v57, 0.0 }
 0x117   : > { %982 = vmatpush.msra.mxu3 %v2309_v0  ;;  %v912_v0 = vld [vmem:[%s3170_s4 + $0x68] sm:$0xff] }
 0x11a   : > { %1995 = vmatmul.msk.f32.vlgmr.msrb.gmra.mxu3 %vm873_vm1, %v909_v22  ;;  %v842_v13 = vpop.f32.mrf.mxu2  ;;  %v1067_v22 = vpop.permute.xlu1 %1066 }
 0x11b   : > { %v854_v1 = vadd.f32 %v842_v13, %v674_v62  ;;  %1796 = vperm.xlu2 %2129, %v1790_v38  }
 0x11d   : > { %v1086_v23 = vmax.f32 %v854_v1, 0.0  ;;  %1236 = vmatpush.msrb.mxu3 %v854_v1 }
 0x11f   : > { %1113 = vmatpush.msra.mxu1 %v1086_v23  ;;  %1237 = vmatpush.msrb.mxu3 %v853_v57 }
 0x121   : > { %1114 = vmatpush.msra.mxu1 %v1085_v2 }
 0x122   : > { %1996 = vmatmul.msk.f32.gmra.mxu3 %vm873_vm1, %v910_v55  ;;  %2007 = vmatmul.msk.f32.vlgmr.msra.gmra.mxu1 %vm873_vm1, %v1081_v47  ;;  %v1062_v13 = vpop.permute.xlu1 %1061 }
 0x12a   : > { %1997 = vmatmul.msk.f32.gmra.mxu3 %vm873_vm1, %v911_v58  ;;  %2008 = vmatmul.msk.f32.gmra.mxu1 %vm873_vm1, %v1082_v49  ;;  %v845_v58 = vpop.f32.mrf.mxu2 }
 0x12b   : > { %v855_v4 = vadd.f32 %v845_v58, %v2809_v33  ;;  %v1074_v33 = vld [vmem:[%s3170_s4 + $0x78] sm:$0xff] }
 0x12d   : > { %v1381_v8 = vmax.f32 %v855_v4, 0.0 }
 0x132   : > { %1998 = vmatmul.msk.f32.gmra.mxu3 %vm873_vm1, %v912_v0  ;;  %v1057_v0 = vpop.permute.xlu2 %1056 }
 0x13a   : > { %1999 = vmatmul.msk.f32.vlgmr.msra.gmra.mxu3 %vm954_vm4, %v905_v50  ;;  %v1052_v60 = vpop.permute.xlu2 %1051 }
 0x142   : > { %2000 = vmatmul.msk.f32.gmra.mxu3 %vm954_vm4, %v906_v10  ;;  %v1083_v10 = vld [vmem:[%s3170_s4 + $0xa0] sm:$0xff] }
 0x143   : > { %2009 = vmatmul.msk.f32.gmra.mxu1 %vm873_vm1, %v1083_v10 }
 0x14a   : > { %2001 = vmatmul.msk.f32.gmra.mxu3 %vm954_vm4, %v907_v30 }
 0x14b   : > { %2010 = vmatmul.msk.f32.gmra.mxu1 %vm873_vm1, %v1084_v63 }
 0x152   : > { %2002 = vmatmul.msk.f32.gmra.mxu3 %vm954_vm4, %v908_v54  ;;  %v848_v54 = vpop.f32.mrf.mxu2 }
 0x153   : > { %v856_v9 = vadd.f32 %v848_v54, %v680_v7  ;;  %v1379_v7 = vld [vmem:[%s3170_s4 + $0x140] sm:$0xff] }
 0x155   : > { %v1382_v5 = vmax.f32 %v856_v9, 0.0 }
 0x18f   : > { %v897_v15 = vpop.f32.mrf.mxu1 }
 0x190   : > { %v898_v21 = vadd.f32 %v897_v15, %v866_v20  ;;  %v1076_v15 = vld [vmem:[%s3170_s4 + $0x88] sm:$0xff]  ;;  %v1206_v20 = vld [vmem:[%s3170_s4 + $0xf0] sm:$0xff] }
 0x191   : > { %2015 = vmatmul.msk.f32.vlgmr.msrb.gmra.mxu3 %vm873_vm1, %v1206_v20 }
 0x192   : > { %v903_v27 = vmax.f32 %v898_v21, 0.0 }
 0x195   : > { %v900_v11 = vpop.f32.mrf.mxu3 }
 0x196   : > { %v901_v17 = vadd.f32 %v900_v11, %v871_v6 }
 0x198   : > { %v904_v25 = vmax.f32 %v901_v17, 0.0  ;;  %v1202_v17 = vld [vmem:[%s3170_s4 + $0xd0] sm:$0xff] }
 0x199   : > { %2016 = vmatmul.msk.f32.gmra.mxu3 %vm873_vm1, %v1207_v24 }
 0x19a   : > { %1026 = vmatpush.msrb.mxu0 %v904_v25 }
 0x19c   : > { %1027 = vmatpush.msrb.mxu0 %v903_v27  ;;  %v1203_v27 = vld [vmem:[%s3170_s4 + $0xd8] sm:$0xff] }
 0x19d   : > { %2003 = vmatmul.msk.f32.vlgmr.msrb.gmra.mxu0 %vm873_vm1, %v996_v28  ;;  %v942_v34 = vpop.f32.mrf.mxu3  ;;  %v1208_v28 = vld [vmem:[%s3170_s4 + $0x100] sm:$0xff] }
 0x19f   : > { %v1116_v16 = vpop.f32.mrf.mxu1 }
 0x1a1   : > { %2017 = vmatmul.msk.f32.gmra.mxu3 %vm873_vm1, %v1208_v28  ;;  %v1369_v28 = vld [vmem:[%s3170_s4 + $0x110] sm:$0xff] }
 0x1a5   : > { %2004 = vmatmul.msk.f32.gmra.mxu0 %vm873_vm1, %v997_v18  ;;  %v945_v39 = vpop.f32.mrf.mxu3  ;;  %v1204_v18 = vld [vmem:[%s3170_s4 + $0xe0] sm:$0xff] }
 0x1a7   : > { %v1119_v21 = vpop.f32.mrf.mxu1 }
 0x1a9   : > { %2018 = vmatmul.msk.f32.gmra.mxu3 %vm873_vm1, %v1209_v36 }
 0x1ad   : > { %2005 = vmatmul.msk.f32.gmra.mxu0 %vm873_vm1, %v998_v37  ;;  %v948_v42 = vpop.f32.mrf.mxu3  ;;  %v1192_v37 = vpop.permute.xlu0 %1191 }
 0x1b5   : > { %2006 = vmatmul.msk.f32.gmra.mxu0 %vm873_vm1, %v999_v32  ;;  %v951_v19 = vpop.f32.mrf.mxu3  ;;  %v1177_v49 = vpop.permute.xlu0 %1176 }
 0x1bd   : > { %v984_v43 = vpop.f32.mrf.mxu3 }
 0x1be   : > { %v985_v56 = vadd.f32 %v984_v43, %v942_v34 }
 0x1c0   : > { %v1122_v29 = vpop.f32.mrf.mxu1 }
 0x1c5   : > { %v987_v44 = vpop.f32.mrf.mxu3 }
 0x1c6   : > { %v988_v51 = vadd.f32 %v987_v44, %v945_v39 }
 0x1c8   : > { %v1125_v31 = vpop.f32.mrf.mxu1 }
 0x1cd   : > { %v990_v48 = vpop.f32.mrf.mxu3 }
 0x1ce   : > { %v991_v50 = vadd.f32 %v990_v48, %v948_v42  ;;  %v1205_v42 = vld [vmem:[%s3170_s4 + $0xe8] sm:$0xff] }
 0x1d5   : > { %v993_v45 = vpop.f32.mrf.mxu3 }
 0x1d6   : > { %v994_v52 = vadd.f32 %v993_v45, %v951_v19  ;;  %v1187_v19 = vpop.permute.xlu1 %1186  ;;  %v1292_v45 = vld [vmem:[%s3170_s4 + $0xb0] sm:$0xff] }
 0x21a   : > { %v1029_v40 = vpop.f32.mrf.mxu0 }
 0x21b   : > { %v1041_v1 = vadd.f32 %v1029_v40, %v985_v56 }
 0x21d   : > { %v1069_v14 = vadd.f32 %v1052_v60, %v1041_v1 }
 0x21f   : > { %v1077_v6 = vmax.f32 %v1069_v14, 0.0 }
 0x222   : > { %v1032_v46 = vpop.f32.mrf.mxu0 }
 0x223   : > { %v1042_v57 = vadd.f32 %v1032_v46, %v988_v51  ;;  %v1182_v46 = vpop.permute.xlu2 %1181  ;;  %v1294_v51 = vld [vmem:[%s3170_s4 + $0xc0] sm:$0xff] }
 0x225   : > { %v1070_v23 = vadd.f32 %v1057_v0, %v1042_v57 }
 0x227   : > { %v1078_v3 = vmax.f32 %v1070_v23, 0.0 }
 0x22a   : > { %v1035_v55 = vpop.f32.mrf.mxu0 }
 0x22b   : > { %v1043_v26 = vadd.f32 %v1035_v55, %v991_v50  ;;  %v1293_v50 = vld [vmem:[%s3170_s4 + $0xb8] sm:$0xff] }
 0x22d   : > { %v1071_v30 = vadd.f32 %v1062_v13, %v1043_v26  ;;  %v1239_v26 = vpop.f32.mrf.mxu3 }
 0x22f   : > { %v1079_v61 = vmax.f32 %v1071_v30, 0.0 }
 0x232   : > { %v1038_v53 = vpop.f32.mrf.mxu0 }
 0x233   : > { %v1044_v62 = vadd.f32 %v1038_v53, %v994_v52  ;;  %v1295_v52 = vld [vmem:[%s3170_s4 + $0xc8] sm:$0xff] }
 0x235   : > { %v1072_v59 = vadd.f32 %v1067_v22, %v1044_v62  ;;  %v1242_v53 = vpop.f32.mrf.mxu3  ;;  %v1377_v62 = vld [vmem:[%s3170_s4 + $0x130] sm:$0xff] }
 0x237   : > { %v1080_v2 = vmax.f32 %v1072_v59, 0.0  ;;  %1275 = vmatpush.msra.mxu0 %v1072_v59  ;;  %v1378_v59 = vld [vmem:[%s3170_s4 + $0x138] sm:$0xff] }
 0x239   : > { %1153 = vmatpush.msra.mxu2 %v1080_v2  ;;  %1276 = vmatpush.msra.mxu0 %v1071_v30 }
 0x23b   : > { %1154 = vmatpush.msra.mxu2 %v1079_v61  ;;  %1277 = vmatpush.msra.mxu0 %v1070_v23 }
 0x23d   : > { %1155 = vmatpush.msra.mxu2 %v1078_v3  ;;  %1278 = vmatpush.msra.mxu0 %v1069_v14  ;;  %v1245_v13 = vpop.f32.mrf.mxu3  ;;  %v1363_v14 = vpop.permute.xlu1 %1362 }
 0x23e   : > { %2019 = vmatmul.msk.f32.vlgmr.msra.gmra.mxu0 %vm1128_vm5, %v1202_v17 }
 0x23f   : > { %1531 = vmatpush.msrb.mxu0 %v856_v9  ;;  %1156 = vmatpush.msra.mxu2 %v1077_v6 }
 0x240   : > { %2011 = vmatmul.msk.f32.vlgmr.msra.gmra.mxu2 %vm1128_vm5, %v1073_v41 }
 0x241   : > { %1532 = vmatpush.msrb.mxu0 %v855_v4  ;;  %1409 = vmatpush.msrb.mxu2 %v1382_v5  ;;  %v1358_v5 = vpop.permute.xlu2 %1357 }
 0x243   : > { %1410 = vmatpush.msrb.mxu2 %v1381_v8 }
 0x245   : > { %v1248_v2 = vpop.f32.mrf.mxu3 }
 0x246   : > { %2020 = vmatmul.msk.f32.gmra.mxu0 %vm1128_vm5, %v1203_v27 }
 0x248   : > { %2012 = vmatmul.msk.f32.gmra.mxu2 %vm1128_vm5, %v1074_v33 }
 0x24e   : > { %2021 = vmatmul.msk.f32.gmra.mxu0 %vm1128_vm5, %v1204_v18  ;;  %v1372_v18 = vld [vmem:[%s3170_s4 + $0x128] sm:$0xff] }
 0x250   : > { %2013 = vmatmul.msk.f32.gmra.mxu2 %vm1128_vm5, %v1075_v12 }
 0x256   : > { %2022 = vmatmul.msk.f32.gmra.mxu0 %vm1128_vm5, %v1205_v42  ;;  %v1502_v42 = vld [vmem:[%s3170_s4 + $0x198] sm:$0xff] }
 0x258   : > { %2014 = vmatmul.msk.f32.gmra.mxu2 %vm1128_vm5, %v1076_v15  ;;  %v1380_v15 = vld [vmem:[%s3170_s4 + $0x148] sm:$0xff] }
 0x260   : > { %2027 = vmatmul.msk.f32.vlgmr.msrb.gmra.mxu2 %vm873_vm1, %v1377_v62 }
 0x268   : > { %2028 = vmatmul.msk.f32.gmra.mxu2 %vm873_vm1, %v1378_v59  ;;  %v1588_v59 = vld [vmem:[%s3170_s4 + $0x158] sm:$0xff] }
 0x270   : > { %2029 = vmatmul.msk.f32.gmra.mxu2 %vm873_vm1, %v1379_v7 }
 0x278   : > { %2030 = vmatmul.msk.f32.gmra.mxu2 %vm873_vm1, %v1380_v15 }
 0x2bb   : > { %v1280_v10 = vpop.f32.mrf.mxu0 }
 0x2bc   : > { %v1281_v9 = vadd.f32 %v1280_v10, %v1239_v26 }
 0x2c3   : > { %v1158_v11 = vpop.f32.mrf.mxu2  ;;  %v1283_v56 = vpop.f32.mrf.mxu0 }
 0x2c4   : > { %v1159_v43 = vadd.f32 %v1158_v11, %v1116_v16  ;;  %v1284_v61 = vadd.f32 %v1283_v56, %v1242_v53  ;;  %v1353_v16 = vpop.permute.xlu0 %1352  ;;  %v1504_v53 = vld [vmem:[%s3170_s4 + $0x1a8] sm:$0xff] }
 0x2c5   : > { %v1500_v56 = vld [vmem:[%s3170_s4 + $0x188] sm:$0xff] }
 0x2c6   : > { %v1194_v22 = vadd.f32 %v1177_v49, %v1159_v43 }
 0x2c8   : > { %v1198_v0 = vmax.f32 %v1194_v22, 0.0 }
 0x2cb   : > { %v1161_v25 = vpop.f32.mrf.mxu2  ;;  %v1286_v30 = vpop.f32.mrf.mxu0 }
 0x2cc   : > { %v1162_v34 = vadd.f32 %v1161_v25, %v1119_v21  ;;  %v1287_v60 = vadd.f32 %v1286_v30, %v1245_v13  ;;  %v1348_v21 = vpop.permute.xlu1 %1347  ;;  %v1587_v30 = vld [vmem:[%s3170_s4 + $0x150] sm:$0xff] }
 0x2ce   : > { %v1195_v47 = vadd.f32 %v1182_v46, %v1162_v34  ;;  %v1503_v46 = vld [vmem:[%s3170_s4 + $0x1a0] sm:$0xff] }
 0x2d0   : > { %v1199_v58 = vmax.f32 %v1195_v47, 0.0  ;;  %v1499_v47 = vld [vmem:[%s3170_s4 + $0x180] sm:$0xff] }
 0x2d3   : > { %v1164_v35 = vpop.f32.mrf.mxu2  ;;  %v1289_v54 = vpop.f32.mrf.mxu0 }
 0x2d4   : > { %v1165_v32 = vadd.f32 %v1164_v35, %v1122_v29  ;;  %v1290_v63 = vadd.f32 %v1289_v54, %v1248_v2  ;;  %v1370_v29 = vld [vmem:[%s3170_s4 + $0x118] sm:$0xff]  ;;  %v1371_v35 = vld [vmem:[%s3170_s4 + $0x120] sm:$0xff]  ;;  %v1590_v2 = vld [vmem:[%s3170_s4 + $0x168] sm:$0xff] }
 0x2d6   : > { %v1196_v44 = vadd.f32 %v1187_v19, %v1165_v32  ;;  %v1501_v32 = vld [vmem:[%s3170_s4 + $0x190] sm:$0xff]  ;;  %v1498_v19 = vld [vmem:[%s3170_s4 + $0x178] sm:$0xff] }
 0x2d7   : > { %2035 = vmatmul.msk.f32.vlgmr.msrb.gmra.mxu0 %vm873_vm1, %v1501_v32 }
 0x2d8   : > { %v1200_v55 = vmax.f32 %v1196_v44, 0.0  ;;  %v1487_v44 = vpop.permute.xlu2 %1486 }
 0x2db   : > { %v1167_v38 = vpop.f32.mrf.mxu2 }
 0x2dc   : > { %v1168_v39 = vadd.f32 %v1167_v38, %v1125_v31  ;;  %v1497_v38 = vld [vmem:[%s3170_s4 + $0x170] sm:$0xff] }
 0x2de   : > { %v1197_v40 = vadd.f32 %v1192_v37, %v1168_v39 }
 0x2df   : > { %2036 = vmatmul.msk.f32.gmra.mxu0 %vm873_vm1, %v1502_v42  ;;  %v1667_v42 = vld [vmem:[%s3170_s4 + $0x1c8] sm:$0xff] }
 0x2e0   : > { %v1201_v48 = vmax.f32 %v1197_v40, 0.0  ;;  %v1472_v10 = vpop.permute.xlu2 %1471 }
 0x2e2   : > { %1320 = vmatpush.msrb.mxu1 %v1201_v48 }
 0x2e3   : > { %v1412_v36 = vpop.f32.mrf.mxu2 }
 0x2e4   : > { %1321 = vmatpush.msrb.mxu1 %v1200_v55 }
 0x2e6   : > { %1322 = vmatpush.msrb.mxu1 %v1199_v58  ;;  %v1482_v58 = vpop.permute.xlu0 %1481 }
 0x2e7   : > { %2037 = vmatmul.msk.f32.gmra.mxu0 %vm873_vm1, %v1503_v46 }
 0x2e8   : > { %1323 = vmatpush.msrb.mxu1 %v1198_v0 }
 0x2e9   : > { %2023 = vmatmul.msk.f32.vlgmr.msrb.gmra.mxu1 %vm1128_vm5, %v1292_v45 }
 0x2eb   : > { %v1415_v31 = vpop.f32.mrf.mxu2 }
 0x2ef   : > { %2038 = vmatmul.msk.f32.gmra.mxu0 %vm873_vm1, %v1504_v53  ;;  %v1743_v53 = vld [vmem:[%s3170_s4 + $0x1e0] sm:$0xff] }
 0x2f1   : > { %2024 = vmatmul.msk.f32.gmra.mxu1 %vm1128_vm5, %v1293_v50 }
 0x2f3   : > { %v1418_v39 = vpop.f32.mrf.mxu2 }
 0x2f9   : > { %2025 = vmatmul.msk.f32.gmra.mxu1 %vm1128_vm5, %v1294_v51  ;;  %v1477_v51 = vpop.permute.xlu1 %1476 }
 0x2fb   : > { %v1421_v40 = vpop.f32.mrf.mxu2 }
 0x301   : > { %2026 = vmatmul.msk.f32.gmra.mxu1 %vm1128_vm5, %v1295_v52 }
 0x354   : > { %v1534_v54 = vpop.f32.mrf.mxu0 }
 0x35c   : > { %v1537_v7 = vpop.f32.mrf.mxu0 }
 0x366   : > { %v1325_v57 = vpop.f32.mrf.mxu1 }
 0x367   : > { %v1337_v8 = vadd.f32 %v1325_v57, %v1281_v9 }
 0x369   : > { %v1365_v17 = vadd.f32 %v1348_v21, %v1337_v8  ;;  %v1658_v8 = vpop.permute.xlu0 %1657 }
 0x36b   : > { %v1373_v27 = vmax.f32 %v1365_v17, 0.0 }
 0x36e   : > { %v1328_v1 = vpop.f32.mrf.mxu1 }
 0x36f   : > { %v1338_v6 = vadd.f32 %v1328_v1, %v1284_v61 }
 0x371   : > { %v1366_v20 = vadd.f32 %v1353_v16, %v1338_v6 }
 0x373   : > { %v1374_v25 = vmax.f32 %v1366_v20, 0.0 }
 0x376   : > { %v1331_v23 = vpop.f32.mrf.mxu1 }
 0x377   : > { %v1339_v3 = vadd.f32 %v1331_v23, %v1287_v60  ;;  %v1589_v23 = vld [vmem:[%s3170_s4 + $0x160] sm:$0xff] }
 0x379   : > { %v1367_v33 = vadd.f32 %v1358_v5, %v1339_v3 }
 0x37b   : > { %v1375_v24 = vmax.f32 %v1367_v33, 0.0 }
 0x37e   : > { %v1334_v4 = vpop.f32.mrf.mxu1 }
 0x37f   : > { %v1340_v41 = vadd.f32 %v1334_v4, %v1290_v63  ;;  %v1540_v63 = vpop.f32.mrf.mxu0 }
 0x381   : > { %v1368_v12 = vadd.f32 %v1363_v14, %v1340_v41 }
 0x383   : > { %v1376_v11 = vmax.f32 %v1368_v12, 0.0  ;;  %1570 = vmatpush.msra.mxu1 %v1368_v12 }
 0x385   : > { %1448 = vmatpush.msra.mxu3 %v1376_v11  ;;  %1571 = vmatpush.msra.mxu1 %v1367_v33 }
 0x387   : > { %1449 = vmatpush.msra.mxu3 %v1375_v24  ;;  %1572 = vmatpush.msra.mxu1 %v1366_v20  ;;  %v1543_v6 = vpop.f32.mrf.mxu0 }
 0x389   : > { %1450 = vmatpush.msra.mxu3 %v1374_v25  ;;  %1573 = vmatpush.msra.mxu1 %v1365_v17  ;;  %v1653_v17 = vpop.permute.xlu1 %1652 }
 0x38a   : > { %2039 = vmatmul.msk.f32.vlgmr.msra.gmra.mxu1 %vm1128_vm5, %v1497_v38  ;;  %v1664_v38 = vld [vmem:[%s3170_s4 + $0x1b0] sm:$0xff] }
 0x38b   : > { %1451 = vmatpush.msra.mxu3 %v1373_v27 }
 0x38c   : > { %2031 = vmatmul.msk.f32.vlgmr.msra.gmra.mxu3 %vm1128_vm5, %v1369_v28  ;;  %v1648_v28 = vpop.permute.xlu2 %1647 }
 0x392   : > { %2040 = vmatmul.msk.f32.gmra.mxu1 %vm1128_vm5, %v1498_v19 }
 0x394   : > { %2032 = vmatmul.msk.f32.gmra.mxu3 %vm1128_vm5, %v1370_v29  ;;  %v1689_v46 = vpop.permute.xlu2 %1688 }
 0x39a   : > { %2041 = vmatmul.msk.f32.gmra.mxu1 %vm1128_vm5, %v1499_v47 }
 0x39c   : > { %2033 = vmatmul.msk.f32.gmra.mxu3 %vm1128_vm5, %v1371_v35 }
 0x3a2   : > { %2042 = vmatmul.msk.f32.gmra.mxu1 %vm1128_vm5, %v1500_v56  ;;  %v1744_v56 = vld [vmem:[%s3170_s4 + $0x1e8] sm:$0xff] }
 0x3a4   : > { %2034 = vmatmul.msk.f32.gmra.mxu3 %vm1128_vm5, %v1372_v18  ;;  %v1643_v18 = vpop.permute.xlu0 %1642 }
 0x407   : > { %v1575_v60 = vpop.f32.mrf.mxu1 }
 0x408   : > { %v1576_v15 = vadd.f32 %v1575_v60, %v1534_v54 }
 0x40f   : > { %v1453_v37 = vpop.f32.mrf.mxu3  ;;  %v1578_v14 = vpop.f32.mrf.mxu1 }
 0x410   : > { %v1454_v0 = vadd.f32 %v1453_v37, %v1412_v36  ;;  %v1579_v33 = vadd.f32 %v1578_v14, %v1537_v7 }
 0x412   : > { %v1489_v57 = vadd.f32 %v1472_v10, %v1454_v0  ;;  %v1742_v10 = vld [vmem:[%s3170_s4 + $0x1d8] sm:$0xff] }
 0x414   : > { %v1493_v1 = vmax.f32 %v1489_v57, 0.0 }
 0x417   : > { %v1456_v34 = vpop.f32.mrf.mxu3  ;;  %v1581_v3 = vpop.f32.mrf.mxu1 }
 0x418   : > { %v1457_v22 = vadd.f32 %v1456_v34, %v1415_v31  ;;  %v1582_v5 = vadd.f32 %v1581_v3, %v1540_v63  ;;  %v1665_v34 = vld [vmem:[%s3170_s4 + $0x1b8] sm:$0xff] }
 0x41a   : > { %v1490_v52 = vadd.f32 %v1477_v51, %v1457_v22  ;;  %v1684_v22 = vpop.permute.xlu0 %1683 }
 0x41c   : > { %v1494_v13 = vmax.f32 %v1490_v52, 0.0 }
 0x41f   : > { %v1459_v43 = vpop.f32.mrf.mxu3  ;;  %v1584_v41 = vpop.f32.mrf.mxu1 }
 0x420   : > { %v1460_v48 = vadd.f32 %v1459_v43, %v1418_v39  ;;  %v1585_v12 = vadd.f32 %v1584_v41, %v1543_v6  ;;  %v1666_v39 = vld [vmem:[%s3170_s4 + $0x1c0] sm:$0xff] }
 0x422   : > { %v1491_v45 = vadd.f32 %v1482_v58, %v1460_v48  ;;  %v1807_v60 = vpop.permute.xlu0 %1806 }
 0x424   : > { %v1495_v62 = vmax.f32 %v1491_v45, 0.0 }
 0x427   : > { %v1462_v49 = vpop.f32.mrf.mxu3 }
 0x428   : > { %v1463_v55 = vadd.f32 %v1462_v49, %v1421_v40  ;;  %v1694_v40 = vpop.permute.xlu1 %1693 }
 0x42a   : > { %v1492_v50 = vadd.f32 %v1487_v44, %v1463_v55  ;;  %v1823_v6 = vpop.permute.xlu0 %1822 }
 0x42c   : > { %v1496_v26 = vmax.f32 %v1492_v50, 0.0 }
 0x42e   : > { %1615 = vmatpush.msra.mxu2 %v1496_v26  ;;  %v1741_v26 = vld [vmem:[%s3170_s4 + $0x1d0] sm:$0xff] }
 0x430   : > { %1616 = vmatpush.msra.mxu2 %v1495_v62  ;;  %v1679_v0 = vpop.permute.xlu1 %1678 }
 0x432   : > { %1617 = vmatpush.msra.mxu2 %v1494_v13 }
 0x434   : > { %1618 = vmatpush.msra.mxu2 %v1493_v1  ;;  %v1812_v1 = vpop.permute.xlu2 %1811 }
 0x435   : > { %2043 = vmatmul.msk.f32.vlgmr.msra.gmra.mxu2 %vm1128_vm5, %v1587_v30 }
 0x43d   : > { %2044 = vmatmul.msk.f32.gmra.mxu2 %vm1128_vm5, %v1588_v59 }
 0x445   : > { %2045 = vmatmul.msk.f32.gmra.mxu2 %vm1128_vm5, %v1589_v23 }
 0x44d   : > { %2046 = vmatmul.msk.f32.gmra.mxu2 %vm1128_vm5, %v1590_v2 }
 0x4b8   : > { %v1620_v61 = vpop.f32.mrf.mxu2 }
 0x4b9   : > { %v1632_v24 = vadd.f32 %v1620_v61, %v1576_v15  ;;  %v1802_v61 = vpop.permute.xlu1 %1801 }
 0x4bb   : > { %v1660_v36 = vadd.f32 %v1643_v18, %v1632_v24 }
 0x4bd   : > { %v1668_v32 = vmax.f32 %v1660_v36, 0.0 }
 0x4c0   : > { %v1623_v9 = vpop.f32.mrf.mxu2 }
 0x4c1   : > { %v1633_v11 = vadd.f32 %v1623_v9, %v1579_v33  ;;  %v1797_v9 = vpop.permute.xlu2 %1796 }
 0x4c3   : > { %v1661_v29 = vadd.f32 %v1648_v28, %v1633_v11 }
 0x4c5   : > { %v1669_v31 = vmax.f32 %v1661_v29, 0.0 }
 0x4c8   : > { %v1626_v4 = vpop.f32.mrf.mxu2 }
 0x4c9   : > { %v1634_v16 = vadd.f32 %v1626_v4, %v1582_v5  ;;  %v1818_v4 = vld [vmem:[%s3170_s4 + $0x1f0] sm:$0xff] }
 0x4cb   : > { %v1662_v25 = vadd.f32 %v1653_v17, %v1634_v16 }
 0x4cd   : > { %v1670_v37 = vmax.f32 %v1662_v25, 0.0 }
 0x4d0   : > { %v1629_v20 = vpop.f32.mrf.mxu2 }
 0x4d1   : > { %v1635_v21 = vadd.f32 %v1629_v20, %v1585_v12 }
 0x4d3   : > { %v1663_v27 = vadd.f32 %v1658_v8, %v1635_v21 }
 0x4d5   : > { %v1671_v35 = vmax.f32 %v1663_v27, 0.0 }
 0x4d7   : > { %1720 = vmatpush.msrb.mxu3 %v1671_v35 }
 0x4d9   : > { %1721 = vmatpush.msrb.mxu3 %v1670_v37 }
 0x4db   : > { %1722 = vmatpush.msrb.mxu3 %v1669_v31 }
 0x4dd   : > { %1723 = vmatpush.msrb.mxu3 %v1668_v32 }
 0x4de   : > { %2047 = vmatmul.msk.f32.vlgmr.msrb.gmra.mxu3 %vm1128_vm5, %v1664_v38 }
 0x4e6   : > { %2048 = vmatmul.msk.f32.gmra.mxu3 %vm1128_vm5, %v1665_v34 }
 0x4ee   : > { %2049 = vmatmul.msk.f32.gmra.mxu3 %vm1128_vm5, %v1666_v39 }
 0x4f6   : > { %2050 = vmatmul.msk.f32.gmra.mxu3 %vm1128_vm5, %v1667_v42 }
 0x561   : > { %v1725_v19 = vpop.f32.mrf.mxu3 }
 0x562   : > { %v1726_v45 = vadd.f32 %v1725_v19, %v1679_v0 }
 0x564   : > { %v1737_v52 = vmax.f32 %v1726_v45, 0.0 }
 0x569   : > { %v1728_v43 = vpop.f32.mrf.mxu3 }
 0x56a   : > { %v1729_v55 = vadd.f32 %v1728_v43, %v1684_v22 }
 0x56c   : > { %v1738_v51 = vmax.f32 %v1729_v55, 0.0 }
 0x571   : > { %v1731_v44 = vpop.f32.mrf.mxu3 }
 0x572   : > { %v1732_v48 = vadd.f32 %v1731_v44, %v1689_v46 }
 0x574   : > { %v1739_v50 = vmax.f32 %v1732_v48, 0.0 }
 0x579   : > { %v1734_v47 = vpop.f32.mrf.mxu3 }
 0x57a   : > { %v1735_v49 = vadd.f32 %v1734_v47, %v1694_v40 }
 0x57c   : > { %v1740_v58 = vmax.f32 %v1735_v49, 0.0 }
 0x57e   : > { %1769 = vmatpush.msra.mxu0 %v1740_v58 }
 0x580   : > { %1770 = vmatpush.msra.mxu0 %v1739_v50 }
 0x582   : > { %1771 = vmatpush.msra.mxu0 %v1738_v51 }
 0x584   : > { %1772 = vmatpush.msra.mxu0 %v1737_v52 }
 0x585   : > { %2051 = vmatmul.msk.f32.vlgmr.msra.gmra.mxu0 %vm1128_vm5, %v1741_v26 }
 0x58d   : > { %2052 = vmatmul.msk.f32.gmra.mxu0 %vm1128_vm5, %v1742_v10 }
 0x595   : > { %2053 = vmatmul.msk.f32.gmra.mxu0 %vm1128_vm5, %v1743_v53 }
 0x59d   : > { %2054 = vmatmul.msk.f32.gmra.mxu0 %vm1128_vm5, %v1744_v56 }
 0x602   : > { %v1774_v57 = vpop.f32.mrf.mxu0 }
 0x603   : > { %v1786_v7 = vadd.f32 %v1774_v57, %v1660_v36 }
 0x605   : > { %v1814_v3 = vadd.f32 %v1797_v9, %v1786_v7 }
 0x60a   : > { %v1777_v62 = vpop.f32.mrf.mxu0 }
 0x60b   : > { %v1787_v2 = vadd.f32 %v1777_v62, %v1661_v29 }
 0x60d   : > { %v1815_v63 = vadd.f32 %v1802_v61, %v1787_v2 }
 0x612   : > { %v1780_v13 = vpop.f32.mrf.mxu0 }
 0x613   : > { %v1788_v59 = vadd.f32 %v1780_v13, %v1662_v25 }
 0x615   : > { %v1816_v14 = vadd.f32 %v1807_v60, %v1788_v59 }
 0x61a   : > { %v1783_v30 = vpop.f32.mrf.mxu0 }
 0x61b   : > { %v1789_v23 = vadd.f32 %v1783_v30, %v1663_v27 }
 0x61d   : > { %v1817_v54 = vadd.f32 %v1812_v1, %v1789_v23 }
 0x61f   : > { %1840 = vmatpush.msrb.mxu1 %v1817_v54 }
 0x621   : > { %1841 = vmatpush.msrb.mxu1 %v1816_v14 }
 0x623   : > { %1842 = vmatpush.msrb.mxu1 %v1815_v63 }
 0x625   : > { %1843 = vmatpush.msrb.mxu1 %v1814_v3 }
 0x626   : > { %2055 = vmatmul.msk.f32.vlgmr.msrb.gmra.mxu1 %vm1128_vm5, %v1818_v4 }
 0x6a3   : > { %v1845_v41 = vpop.f32.mrf.mxu1 }
 0x6a4   : > { %v1846_v5 = vadd.f32 %v1845_v41, %v1823_v6 }
 0x6a6   : > { %1848 = vst [vmem:[%s308_s30] sm:$0x1] %v1846_v5 }
 0x6a7   : > { %2157 = shalt.err (!%p2154_p5)
}
 0x6a8   : > { %2071 = dma.vmem_to_hbm [thread:$0]  (%p2286_p4), %s1862_s8, 16, %s1864_s12, %s1850_s11  }
 0x6a9 PF: > { %p2077_p6 = scmp.ge.s32.totalorder %s2208_s26, 2  ;;  %s1875_s18 = sand.u32 1, %s2188_s21  }
 0x6aa   : > { %s1876_s20 = scalar_lea.sflag [#allocation3], %s1875_s18 }
 0x6ab   : > { %p2074_p7 = pnand %p2077_p6, %p2293_p8 }
 0x6ad   : > { %p2075_p9 = pneg %p2074_p7 }
 0x6af   : > { %2183 = dma.done.wait (%p2075_p9), %s1876_s20, 16  }
 0x6b0   : > { %2185 = vsyncadd (%p2075_p9), %s1876_s20, 4294967280  ;;  %s19_s26 = sadd.s32 1, %s2208_s26   ;;  %s3175_s21 = smov %s2192_s22 }
 0x6b1   : > { %p16_p10 = scmp.ge.s32.totalorder %s19_s26, 4   ;;  %s3176_s22 = smov %s2196_s23 }
 0x6b2   : > { %s3177_s23 = smov %s2299_s10  ;;  %s3178_s24 = smov %s2204_s25 }
 0x6b3   : > { %s3179_s25 = smov %s3181_s29  ;;  %18 = sbr.rel (!%p16_p10) target bundleno = 4 (0x4), region = 88 }
 0x6b8   :  { %1881 = vsyncpa [#allocation3], 1 }
 0x6b9   :  { %1883 = vsyncpa [#allocation3 + $0x1], 1 }

</bundles_post_ra>
